<compile_context>
chip_gen: v7x
topology: tpu7x:2x2x1
jax: 0.10.0
libtpu: 0.0.40
codegen_flags: <defaults>
</compile_context>

<pallas_src>
import numpy as np
import jax
import jax.numpy as jnp
from jax.experimental import pallas as pl
from jax.experimental.pallas import tpu as pltpu

# Module hyper-parameters (hor_out of the hidden VerHor layers is fixed to 56).
V_SIZE = 32      # ver_size
H_IN = 48        # hor_size_in
H_MID = 56       # hidden hor_out (fixed in the module)
P_NUMEL = 25     # patch_numel
OUT_LANES = 128  # lane-dense output width (>= P_NUMEL, multiple of 128)
BN_EPS = 1e-5


def _round_up(n, m):
    return ((n + m - 1) // m) * m


def _rmm(x, w):
    """Batched right matmul: (m, a, k) @ (k, b) -> (m, a, b), f32 MXU accumulate."""
    return jax.lax.dot_general(
        x, w, (((2,), (0,)), ((), ())), preferred_element_type=jnp.float32)


def separable_part2_kernel(
    x_ref,
    wv2_ref, wh2_ref, b2_ref,
    wv3_ref, wh3_ref, b3_ref,
    whor_ref, whoc_ref, wvo_ref, bo_ref,
    o_ref,
):
    cdt = wv2_ref.dtype                                # matmul operand dtype
    x = x_ref[...].astype(cdt)                         # (TM, 48, 32)

    # --- ver_hor_bn_re2 (ver -> hor, BN folded into wh2/b2, ReLU) ------------
    # One transpose; result left in the flipped (ver, hor) layout.
    t = _rmm(x, wv2_ref[...])                          # (TM, 48, 32) f32, ver
    t = jnp.swapaxes(t.astype(cdt), 1, 2)              # (TM, 32, 48)
    y2f = _rmm(t, wh2_ref[...])                        # (TM, 32, 56) f32, hor (BN-scaled)
    y2f = jnp.maximum(y2f + b2_ref[...][None], 0.0)    # flipped (V, H) layout

    # Branch-2 hor contraction for the output stage (a already folded into
    # whor); done right away so y2f's f32 copy dies early.
    h2 = jnp.sum(y2f * whor_ref[...][None], axis=2)    # (TM, 32)
    y2f_c = y2f.astype(cdt)

    # --- ver_hor_bn_re3 (hor -> ver on the flipped input, BN folded, ReLU) ---
    # One transpose; result back in the standard (hor, ver) layout.
    t3 = _rmm(y2f_c, wh3_ref[...])                     # (TM, 32, 56) f32, hor
    t3 = jnp.swapaxes(t3.astype(cdt), 1, 2)            # (TM, 56, 32)
    y3 = _rmm(t3, wv3_ref[...])                        # (TM, 56, 32) f32, ver
    y3 = jnp.maximum(y3 + b3_ref[...][None], 0.0)      # standard (H, V) layout

    # --- ver_hor_out, reassociated, mix scalar folded into whor/whoc ---------
    # out = ver_hor_out(a*y2 + (1-a)*y3): contract the 56-wide hor dim per
    # branch (each in its native layout, a/(1-a) pre-folded), add, then one
    # lane-dense (TM,32)x(32,128) matmul + zero-padded bias.
    h3 = jnp.sum(y3 * whoc_ref[...][None], axis=1)     # (TM, 32)
    h = (h2 + h3).astype(cdt)
    o_ref[...] = (jnp.dot(h, wvo_ref[...], preferred_element_type=jnp.float32)
                  + bo_ref[...])                       # (TM, 128)


def separable_part2(x, params, *, patch_numel=P_NUMEL, tile_m=256,
                    vmem_limit_bytes=64 * 1024 * 1024):
    """SeparablePart2 forward. x: (B, N, 48, 32) f32 -> (B, N, 1, patch_numel)."""
    B, N, H, V = x.shape
    assert (H, V) == (H_IN, V_SIZE)
    (wv2_t, wh2f, b2f, wv3_t, wh3f, b3f,
     who_r_a, who_c_1a, wvo_p, bo_p) = params

    M = B * N
    x2 = x.reshape(M, H, V)

    # Tile over M; ragged last tile is handled by Pallas masked edge stores.
    tm = max(8, min(_round_up(tile_m, 8), _round_up(M, 8)))
    # v7x has 2 TensorCores: keep >= 2 grid steps whenever M allows so both
    # cores get work under dimension_semantics=("parallel",).
    if M > 8 and pl.cdiv(M, tm) < 2:
        tm = max(8, _round_up(pl.cdiv(M, 2), 8))
    grid = (pl.cdiv(M, tm),)

    def full(arr):
        return pl.BlockSpec(arr.shape, lambda i, _nd=arr.ndim: (0,) * _nd)

    grid_spec = pltpu.PrefetchScalarGridSpec(
        num_scalar_prefetch=0,
        grid=grid,
        in_specs=[
            pl.BlockSpec((tm, H, V), lambda i: (i, 0, 0)),
            full(wv2_t), full(wh2f), full(b2f),
            full(wv3_t), full(wh3f), full(b3f),
            full(who_r_a), full(who_c_1a), full(wvo_p), full(bo_p),
        ],
        out_specs=pl.BlockSpec((tm, OUT_LANES), lambda i: (i, 0)),
    )

    out = pl.pallas_call(
        separable_part2_kernel,
        out_shape=jax.ShapeDtypeStruct((M, OUT_LANES), jnp.float32),
        grid_spec=grid_spec,
        compiler_params=pltpu.CompilerParams(
            dimension_semantics=("parallel",),
            vmem_limit_bytes=vmem_limit_bytes),
    )(x2, wv2_t, wh2f, b2f, wv3_t, wh3f, b3f, who_r_a, who_c_1a, wvo_p, bo_p)

    return out[:, :patch_numel].reshape(B, N, 1, patch_numel)


def prepare_params(raw, matmul_dtype=jnp.bfloat16):
    """Fold eval-mode BN into the hor weights/biases, fold the mix scalar `a`
    into the output-stage weights, pre-transpose linears, pad the output
    projection to a lane-dense 128 width."""
    (Wv2, Wh2, b2, g2, be2, rm2, rv2,
     Wv3, Wh3, b3, g3, be3, rm3, rv3,
     a, Wvo, Who, bo) = raw
    P = bo.shape[1]

    s2 = g2 / jnp.sqrt(rv2 + BN_EPS)
    t2 = be2 - rm2 * s2
    s3 = g3 / jnp.sqrt(rv3 + BN_EPS)
    t3 = be3 - rm3 * s3
    a = jnp.asarray(a, jnp.float32).reshape(())

    wv2_t = Wv2.T.astype(matmul_dtype)                 # (32, 32)
    wh2f = (Wh2.T * s2[None, :]).astype(matmul_dtype)  # (48, 56) BN folded
    b2f = (b2 * s2[:, None] + t2[:, None]).T           # (32, 56) flipped-layout bias
    wv3_t = Wv3.T.astype(matmul_dtype)                 # (32, 32)
    wh3f = (Wh3.T * s3[None, :]).astype(matmul_dtype)  # (56, 56) BN folded
    b3f = b3 * s3[:, None] + t3[:, None]               # (56, 32) standard-layout bias

    who_r_a = (a * Who).astype(jnp.float32)            # (1, 56)  a folded, flipped branch
    who_c_1a = ((1.0 - a) * Who.T).astype(jnp.float32)  # (56, 1) 1-a folded, std branch
    wvo_p = jnp.pad(Wvo.T, ((0, 0), (0, OUT_LANES - P))).astype(matmul_dtype)  # (32,128)
    bo_p = jnp.pad(bo, ((0, 0), (0, OUT_LANES - P))).astype(jnp.float32)       # (1,128)

    return (wv2_t, wh2f, b2f, wv3_t, wh3f, b3f, who_r_a, who_c_1a, wvo_p, bo_p)


def init_params(key):
    """Deterministic parameters matching the PyTorch module's shapes/inits."""
    ks = list(jax.random.split(key, 17))

    def linear_w(k, out_f, in_f):
        # nn.Linear default: kaiming_uniform(a=sqrt(5)) -> U(-1/sqrt(in), 1/sqrt(in))
        bound = 1.0 / float(in_f) ** 0.5
        return jax.random.uniform(k, (out_f, in_f), jnp.float32, -bound, bound)

    def xavier_b(k, hor_out, ver_out):
        # xavier_normal_ with gain = calculate_gain('relu') = sqrt(2)
        std = (2.0 ** 0.5) * (2.0 / (hor_out + ver_out)) ** 0.5
        return std * jax.random.normal(k, (hor_out, ver_out), jnp.float32)

    Wv2 = linear_w(ks[0], V_SIZE, V_SIZE)
    Wh2 = linear_w(ks[1], H_MID, H_IN)
    b2 = xavier_b(ks[2], H_MID, V_SIZE)
    Wv3 = linear_w(ks[3], V_SIZE, V_SIZE)
    Wh3 = linear_w(ks[4], H_MID, H_MID)
    b3 = xavier_b(ks[5], H_MID, V_SIZE)
    Wvo = linear_w(ks[6], P_NUMEL, V_SIZE)
    Who = linear_w(ks[7], 1, H_MID)
    bo = xavier_b(ks[8], 1, P_NUMEL)

    # BatchNorm2d(56) inference-mode params/buffers. PyTorch defaults are
    # (weight=1, bias=0, mean=0, var=1); non-trivial values exercise the fold.
    g2 = 1.0 + 0.1 * jax.random.normal(ks[9], (H_MID,), jnp.float32)
    be2 = 0.1 * jax.random.normal(ks[10], (H_MID,), jnp.float32)
    rm2 = 0.1 * jax.random.normal(ks[11], (H_MID,), jnp.float32)
    rv2 = 1.0 + 0.1 * jax.random.uniform(ks[12], (H_MID,), jnp.float32)
    g3 = 1.0 + 0.1 * jax.random.normal(ks[13], (H_MID,), jnp.float32)
    be3 = 0.1 * jax.random.normal(ks[14], (H_MID,), jnp.float32)
    rm3 = 0.1 * jax.random.normal(ks[15], (H_MID,), jnp.float32)
    rv3 = 1.0 + 0.1 * jax.random.uniform(ks[16], (H_MID,), jnp.float32)

    # a = nn.Parameter(torch.tensor((0,))): PyTorch init is 0; use a nonzero
    # value so the learned-mix path is exercised by the check.
    a = jnp.full((1,), 0.3, jnp.float32)

    return (Wv2, Wh2, b2, g2, be2, rm2, rv2,
            Wv3, Wh3, b3, g3, be3, rm3, rv3,
            a, Wvo, Who, bo)


def reference(x, raw):
    """Pure-JAX reference of the PyTorch forward (inference-mode BN)."""
    (Wv2, Wh2, b2, g2, be2, rm2, rv2,
     Wv3, Wh3, b3, g3, be3, rm3, rv3,
     a, Wvo, Who, bo) = raw

    def vh(x, Wv, Wh, b):
        t = x @ Wv.T                                              # ver on last dim
        t = jnp.swapaxes(jnp.swapaxes(t, -1, -2) @ Wh.T, -1, -2)  # hor on dim -2
        return t + b

    def bn(x, g, be, rm, rv):  # eval-mode BatchNorm2d over the hor-channel dim
        s = g / jnp.sqrt(rv + BN_EPS)
        return x * s[:, None] + (be - rm * s)[:, None]

    y2 = jax.nn.relu(bn(vh(x, Wv2, Wh2, b2), g2, be2, rm2, rv2))
    y3 = jax.nn.relu(bn(vh(y2, Wv3, Wh3, b3), g3, be3, rm3, rv3))
    ymix = a * y2 + (1.0 - a) * y3
    return vh(ymix, Wvo, Who, bo)                                 # (..., 1, P)


if __name__ == "__main__":
    key = jax.random.PRNGKey(0)
    kx, kp = jax.random.split(key)
    raw = init_params(kp)

    params_f32 = prepare_params(raw, matmul_dtype=jnp.float32)
    params_bf16 = prepare_params(raw, matmul_dtype=jnp.bfloat16)

    # (2, 8) tiles evenly; (3, 7) exercises the ragged (masked) last M tile.
    for (B, N) in [(2, 8), (3, 7)]:
        x = jax.random.normal(jax.random.fold_in(kx, B * 100 + N),
                              (B, N, H_IN, V_SIZE), jnp.float32)
        ref = reference(x, raw)

        # f32 matmul path: exact module semantics.
        out32 = jax.block_until_ready(separable_part2(x, params_f32))
        assert out32.shape == (B, N, 1, P_NUMEL)
        np.testing.assert_allclose(np.asarray(out32), np.asarray(ref),
                                   rtol=5e-4, atol=5e-4)

        # bf16-operand / f32-accumulate path (default for performance).
        outbf = jax.block_until_ready(separable_part2(x, params_bf16))
        assert outbf.shape == (B, N, 1, P_NUMEL)
        np.testing.assert_allclose(np.asarray(outbf), np.asarray(ref),
                                   rtol=5e-2, atol=5e-2)

    print("KERNEL_OK")
</pallas_src>

<mosaic_0001>
module attributes {stable_mosaic.version = 11 : i64} {
  func.func @separable_part2_kernel(%arg0: i32, %arg1: memref<8x48x32xf32, #tpu.memory_space<vmem>>, %arg2: memref<32x32xf32, #tpu.memory_space<vmem>>, %arg3: memref<48x56xf32, #tpu.memory_space<vmem>>, %arg4: memref<32x56xf32, #tpu.memory_space<vmem>>, %arg5: memref<32x32xf32, #tpu.memory_space<vmem>>, %arg6: memref<56x56xf32, #tpu.memory_space<vmem>>, %arg7: memref<56x32xf32, #tpu.memory_space<vmem>>, %arg8: memref<1x56xf32, #tpu.memory_space<vmem>>, %arg9: memref<56x1xf32, #tpu.memory_space<vmem>>, %arg10: memref<32x128xf32, #tpu.memory_space<vmem>>, %arg11: memref<1x128xf32, #tpu.memory_space<vmem>>, %arg12: memref<8x128xf32, #tpu.memory_space<vmem>>) attributes {dimension_semantics = [#tpu.dimension_semantics<parallel>], iteration_bounds = array<i64: 2>, scalar_prefetch = 0 : i64, scratch_operands = 0 : i64, tpu.core_type = #tpu.core_type<tc>, window_params = [{transform_indices = @transform_0, window_bounds = array<i64: 8, 48, 32>}, {pipeline_mode = #tpu.pipeline_mode<synchronous>, transform_indices = @transform_1, window_bounds = array<i64: 32, 32>}, {pipeline_mode = #tpu.pipeline_mode<synchronous>, transform_indices = @transform_2, window_bounds = array<i64: 48, 56>}, {pipeline_mode = #tpu.pipeline_mode<synchronous>, transform_indices = @transform_3, window_bounds = array<i64: 32, 56>}, {pipeline_mode = #tpu.pipeline_mode<synchronous>, transform_indices = @transform_4, window_bounds = array<i64: 32, 32>}, {pipeline_mode = #tpu.pipeline_mode<synchronous>, transform_indices = @transform_5, window_bounds = array<i64: 56, 56>}, {pipeline_mode = #tpu.pipeline_mode<synchronous>, transform_indices = @transform_6, window_bounds = array<i64: 56, 32>}, {pipeline_mode = #tpu.pipeline_mode<synchronous>, transform_indices = @transform_7, window_bounds = array<i64: 1, 56>}, {pipeline_mode = #tpu.pipeline_mode<synchronous>, transform_indices = @transform_8, window_bounds = array<i64: 56, 1>}, {pipeline_mode = #tpu.pipeline_mode<synchronous>, transform_indices = @transform_9, window_bounds = array<i64: 32, 128>}, {pipeline_mode = #tpu.pipeline_mode<synchronous>, transform_indices = @transform_10, window_bounds = array<i64: 1, 128>}, {transform_indices = @transform_11, window_bounds = array<i64: 8, 128>}]} {
    %c0 = arith.constant 0 : index
    %c0_0 = arith.constant 0 : index
    %c0_1 = arith.constant 0 : index
    %0 = vector.load %arg1[%c0, %c0_0, %c0_1] : memref<8x48x32xf32, #tpu.memory_space<vmem>>, vector<8x48x32xf32>
    %c0_2 = arith.constant 0 : index
    %c0_3 = arith.constant 0 : index
    %1 = vector.load %arg2[%c0_2, %c0_3] : memref<32x32xf32, #tpu.memory_space<vmem>>, vector<32x32xf32>
    %cst = arith.constant dense<0.000000e+00> : vector<8x48x32xf32>
    %2 = tpu.matmul %0, %1, %cst {dimension_numbers = #tpu.dot_dimension_numbers<[2], [0], [0, 1], [1], [0, 0, 0, 1, 1, 1], [], []>} : vector<8x48x32xf32>, vector<32x32xf32>, vector<8x48x32xf32> -> vector<8x48x32xf32>
    %3 = tpu.transpose %2, [0, 2, 1] : vector<8x48x32xf32> -> vector<8x32x48xf32>
    %c0_4 = arith.constant 0 : index
    %c0_5 = arith.constant 0 : index
    %4 = vector.load %arg3[%c0_4, %c0_5] : memref<48x56xf32, #tpu.memory_space<vmem>>, vector<48x56xf32>
    %cst_6 = arith.constant dense<0.000000e+00> : vector<8x32x56xf32>
    %5 = tpu.matmul %3, %4, %cst_6 {dimension_numbers = #tpu.dot_dimension_numbers<[2], [0], [0, 1], [1], [0, 0, 0, 1, 1, 1], [], []>} : vector<8x32x48xf32>, vector<48x56xf32>, vector<8x32x56xf32> -> vector<8x32x56xf32>
    %c0_7 = arith.constant 0 : index
    %c0_8 = arith.constant 0 : index
    %6 = vector.load %arg4[%c0_7, %c0_8] : memref<32x56xf32, #tpu.memory_space<vmem>>, vector<32x56xf32>
    %7 = vector.shape_cast %6 : vector<32x56xf32> to vector<1x32x56xf32>
    %8 = vector.broadcast %7 : vector<1x32x56xf32> to vector<8x32x56xf32>
    %9 = arith.addf %5, %8 : vector<8x32x56xf32>
    %cst_9 = arith.constant 0.000000e+00 : f32
    %10 = vector.broadcast %cst_9 : f32 to vector<8x32x56xf32>
    %11 = arith.maximumf %9, %10 : vector<8x32x56xf32>
    %c0_10 = arith.constant 0 : index
    %c0_11 = arith.constant 0 : index
    %12 = vector.load %arg8[%c0_10, %c0_11] : memref<1x56xf32, #tpu.memory_space<vmem>>, vector<1x56xf32>
    %13 = vector.shape_cast %12 : vector<1x56xf32> to vector<1x1x56xf32>
    %14 = vector.broadcast %13 : vector<1x1x56xf32> to vector<8x32x56xf32>
    %15 = arith.mulf %11, %14 : vector<8x32x56xf32>
    %cst_12 = arith.constant dense<0.000000e+00> : vector<8x32xf32>
    %16 = vector.multi_reduction <add>, %15, %cst_12 [2] : vector<8x32x56xf32> to vector<8x32xf32>
    %c0_13 = arith.constant 0 : index
    %c0_14 = arith.constant 0 : index
    %17 = vector.load %arg6[%c0_13, %c0_14] : memref<56x56xf32, #tpu.memory_space<vmem>>, vector<56x56xf32>
    %cst_15 = arith.constant dense<0.000000e+00> : vector<8x32x56xf32>
    %18 = tpu.matmul %11, %17, %cst_15 {dimension_numbers = #tpu.dot_dimension_numbers<[2], [0], [0, 1], [1], [0, 0, 0, 1, 1, 1], [], []>} : vector<8x32x56xf32>, vector<56x56xf32>, vector<8x32x56xf32> -> vector<8x32x56xf32>
    %19 = tpu.transpose %18, [0, 2, 1] : vector<8x32x56xf32> -> vector<8x56x32xf32>
    %c0_16 = arith.constant 0 : index
    %c0_17 = arith.constant 0 : index
    %20 = vector.load %arg5[%c0_16, %c0_17] : memref<32x32xf32, #tpu.memory_space<vmem>>, vector<32x32xf32>
    %cst_18 = arith.constant dense<0.000000e+00> : vector<8x56x32xf32>
    %21 = tpu.matmul %19, %20, %cst_18 {dimension_numbers = #tpu.dot_dimension_numbers<[2], [0], [0, 1], [1], [0, 0, 0, 1, 1, 1], [], []>} : vector<8x56x32xf32>, vector<32x32xf32>, vector<8x56x32xf32> -> vector<8x56x32xf32>
    %c0_19 = arith.constant 0 : index
    %c0_20 = arith.constant 0 : index
    %22 = vector.load %arg7[%c0_19, %c0_20] : memref<56x32xf32, #tpu.memory_space<vmem>>, vector<56x32xf32>
    %23 = vector.shape_cast %22 : vector<56x32xf32> to vector<1x56x32xf32>
    %24 = vector.broadcast %23 : vector<1x56x32xf32> to vector<8x56x32xf32>
    %25 = arith.addf %21, %24 : vector<8x56x32xf32>
    %cst_21 = arith.constant 0.000000e+00 : f32
    %26 = vector.broadcast %cst_21 : f32 to vector<8x56x32xf32>
    %27 = arith.maximumf %25, %26 : vector<8x56x32xf32>
    %c0_22 = arith.constant 0 : index
    %c0_23 = arith.constant 0 : index
    %28 = vector.load %arg9[%c0_22, %c0_23] : memref<56x1xf32, #tpu.memory_space<vmem>>, vector<56x1xf32>
    %29 = vector.shape_cast %28 : vector<56x1xf32> to vector<1x56x1xf32>
    %30 = vector.broadcast %29 : vector<1x56x1xf32> to vector<8x56x32xf32>
    %31 = arith.mulf %27, %30 : vector<8x56x32xf32>
    %cst_24 = arith.constant dense<0.000000e+00> : vector<8x32xf32>
    %32 = vector.multi_reduction <add>, %31, %cst_24 [1] : vector<8x56x32xf32> to vector<8x32xf32>
    %33 = arith.addf %16, %32 : vector<8x32xf32>
    %c0_25 = arith.constant 0 : index
    %c0_26 = arith.constant 0 : index
    %34 = vector.load %arg10[%c0_25, %c0_26] : memref<32x128xf32, #tpu.memory_space<vmem>>, vector<32x128xf32>
    %cst_27 = arith.constant dense<0.000000e+00> : vector<8x128xf32>
    %35 = tpu.matmul %33, %34, %cst_27 {dimension_numbers = #tpu.dot_dimension_numbers<[1], [0], [0], [1], [0, 0, 1, 1], [], []>} : vector<8x32xf32>, vector<32x128xf32>, vector<8x128xf32> -> vector<8x128xf32>
    %c0_28 = arith.constant 0 : index
    %c0_29 = arith.constant 0 : index
    %36 = vector.load %arg11[%c0_28, %c0_29] : memref<1x128xf32, #tpu.memory_space<vmem>>, vector<1x128xf32>
    %37 = vector.broadcast %36 : vector<1x128xf32> to vector<8x128xf32>
    %38 = arith.addf %35, %37 : vector<8x128xf32>
    %c0_30 = arith.constant 0 : index
    %c0_31 = arith.constant 0 : index
    %39 = vector.load %arg12[%c0_30, %c0_31] : memref<8x128xf32, #tpu.memory_space<vmem>>, vector<8x128xf32>
    tpu.vector_store %arg12[%c0_30, %c0_31], %38 {strides = array<i32>} : memref<8x128xf32, #tpu.memory_space<vmem>>, vector<8x128xf32>,
    return
  }
  func.func @transform_0(%arg0: i32) -> (i32, i32, i32) {
    %c0_i32 = arith.constant 0 : i32
    %c0_i32_0 = arith.constant 0 : i32
    %c0_i32_1 = arith.constant 0 : i32
    return %arg0, %c0_i32, %c0_i32_0 : i32, i32, i32
  }
  func.func @transform_1(%arg0: i32) -> (i32, i32) {
    %c0_i32 = arith.constant 0 : i32
    %c0_i32_0 = arith.constant 0 : i32
    %c0_i32_1 = arith.constant 0 : i32
    return %c0_i32, %c0_i32_0 : i32, i32
  }
  func.func @transform_2(%arg0: i32) -> (i32, i32) {
    %c0_i32 = arith.constant 0 : i32
    %c0_i32_0 = arith.constant 0 : i32
    %c0_i32_1 = arith.constant 0 : i32
    return %c0_i32, %c0_i32_0 : i32, i32
  }
  func.func @transform_3(%arg0: i32) -> (i32, i32) {
    %c0_i32 = arith.constant 0 : i32
    %c0_i32_0 = arith.constant 0 : i32
    %c0_i32_1 = arith.constant 0 : i32
    return %c0_i32, %c0_i32_0 : i32, i32
  }
  func.func @transform_4(%arg0: i32) -> (i32, i32) {
    %c0_i32 = arith.constant 0 : i32
    %c0_i32_0 = arith.constant 0 : i32
    %c0_i32_1 = arith.constant 0 : i32
    return %c0_i32, %c0_i32_0 : i32, i32
  }
  func.func @transform_5(%arg0: i32) -> (i32, i32) {
    %c0_i32 = arith.constant 0 : i32
    %c0_i32_0 = arith.constant 0 : i32
    %c0_i32_1 = arith.constant 0 : i32
    return %c0_i32, %c0_i32_0 : i32, i32
  }
  func.func @transform_6(%arg0: i32) -> (i32, i32) {
    %c0_i32 = arith.constant 0 : i32
    %c0_i32_0 = arith.constant 0 : i32
    %c0_i32_1 = arith.constant 0 : i32
    return %c0_i32, %c0_i32_0 : i32, i32
  }
  func.func @transform_7(%arg0: i32) -> (i32, i32) {
    %c0_i32 = arith.constant 0 : i32
    %c0_i32_0 = arith.constant 0 : i32
    %c0_i32_1 = arith.constant 0 : i32
    return %c0_i32, %c0_i32_0 : i32, i32
  }
  func.func @transform_8(%arg0: i32) -> (i32, i32) {
    %c0_i32 = arith.constant 0 : i32
    %c0_i32_0 = arith.constant 0 : i32
    %c0_i32_1 = arith.constant 0 : i32
    return %c0_i32, %c0_i32_0 : i32, i32
  }
  func.func @transform_9(%arg0: i32) -> (i32, i32) {
    %c0_i32 = arith.constant 0 : i32
    %c0_i32_0 = arith.constant 0 : i32
    %c0_i32_1 = arith.constant 0 : i32
    return %c0_i32, %c0_i32_0 : i32, i32
  }
  func.func @transform_10(%arg0: i32) -> (i32, i32) {
    %c0_i32 = arith.constant 0 : i32
    %c0_i32_0 = arith.constant 0 : i32
    %c0_i32_1 = arith.constant 0 : i32
    return %c0_i32, %c0_i32_0 : i32, i32
  }
  func.func @transform_11(%arg0: i32) -> (i32, i32) {
    %c0_i32 = arith.constant 0 : i32
    %c0_i32_0 = arith.constant 0 : i32
    return %arg0, %c0_i32 : i32, i32
  }
}

</mosaic_0001>

<bundles_post_ra>
// kernel: tpu_custom_call.1
= control target key start
LH: loop header
LB: loop body
LE: loop exit
PB: predicated region body
PF: predicated region fallthrough
CT: control target
= control target key end

     0   :  { %s6756_s0 = inlined_call_operand.hbm [shape: f32[16,48,32], index: 0, kind: input, shape index: {}]   ;;  %s6757_s1 = inlined_call_operand.hbm [shape: f32[32,32], index: 1, kind: input, shape index: {}]   ;;  %s6758_s2 = inlined_call_operand.hbm [shape: f32[48,56], index: 2, kind: input, shape index: {}]   ;;  %s6759_s3 = inlined_call_operand.hbm [shape: f32[32,56], index: 3, kind: input, shape index: {}]   ;;  %s6760_s4 = inlined_call_operand.hbm [shape: f32[32,32], index: 4, kind: input, shape index: {}]   ;;  %s6761_s5 = inlined_call_operand.hbm [shape: f32[56,56], index: 5, kind: input, shape index: {}]   ;;  %s6762_s6 = inlined_call_operand.hbm [shape: f32[56,32], index: 6, kind: input, shape index: {}]   ;;  %s6763_s7 = inlined_call_operand.hbm [shape: f32[1,56], index: 7, kind: input, shape index: {}]   ;;  %s6764_s8 = inlined_call_operand.hbm [shape: f32[56,1], index: 8, kind: input, shape index: {}]   ;;  %s6765_s9 = inlined_call_operand.hbm [shape: f32[32,128], index: 9, kind: input, shape index: {}]   ;;  %s6766_s10 = inlined_call_operand.hbm [shape: f32[1,128], index: 10, kind: input, shape index: {}]   ;;  %s6767_s11 = inlined_call_operand.hbm [shape: f32[16,128], index: 11, kind: output, shape index: {}]  }
   0x1   :  { %6789 = sst [smem:[#allocation29_spill]] %s6756_s0 }
   0x2   :  { %6790 = sst [smem:[#allocation30_spill]] %s6757_s1 }
   0x3   :  { %6791 = sst [smem:[#allocation31_spill]] %s6758_s2 }
   0x4   :  { %6792 = sst [smem:[#allocation32_spill]] %s6759_s3 }
   0x5   :  { %6793 = sst [smem:[#allocation33_spill]] %s6767_s11 }
   0x6   :  { %16 = vsyncpa [#allocation3], 0 }
   0x7   :  { %18 = vsyncpa [#allocation3 + $0x1], 0 }
   0x8   :  { %19 = vsyncpa [#allocation6], 0 }
   0x9   :  { %20 = vsyncpa [#allocation9], 0 }
   0xa   :  { %21 = vsyncpa [#allocation12], 0 }
   0xb   :  { %22 = vsyncpa [#allocation15], 0 }
   0xc   :  { %23 = vsyncpa [#allocation18], 0 }
   0xd   :  { %24 = vsyncpa [#allocation4], 0 }
   0xe   :  { %26 = vsyncpa [#allocation4 + $0x1], 0  ;;  %s5363_s17 = smov 0   ;;  %s5365_s18 = smov 0  }
   0xf   :  { %s5367_s19 = smov 0   ;;  %s5369_s20 = smov 0  }
  0x10 LB: > { %s5285_s21 = smov [#allocation5]   ;;  %s5384_s23 = sadd.s32 4294967295, %s5283_s20   ;;  %s5283_s20 = sphi %s5369_s20, %s6841_s20   ;;  %s5279_s19 = sphi %s5367_s19, %s6840_s19   ;;  %s5275_s18 = sphi %s5365_s18, %s6839_s18   ;;  %s5271_s17 = sphi %s5363_s17, %s6838_s17  }
  0x11   : > { %s311_s22 = sshll.u32 %s5285_s21, 4  ;;  %p3978_p0 = scmp.ge.s32.totalorder %s5283_s20, 1  ;;  %s5389_s22 = int_to_ptr.vmem [resolvable:$true] %s311_s22 }
  0x12   : > { %p6771_p1 = scmp.eq.s32.totalorder %s5384_s23, 0  ;;  %p299_p2 = scmp.lt.s32.totalorder %s5283_s20, 3 }
  0x13   : > { %s5286_s25 = smov [#allocation8]   ;;  %s5287_s28 = smov [#allocation11]  }
  0x14   : > { %p5391_p3 = pnand %p3978_p0, %p299_p2  ;;  %s337_s26 = sshll.u32 %s5286_s25, 4  ;;  %s5404_s26 = int_to_ptr.vmem [resolvable:$true] %s337_s26 }
  0x15   : > { %s363_s29 = sshll.u32 %s5287_s28, 4  ;;  %s6797_s1 = sld [smem:[#allocation30_spill]]  ;;  %s5406_s29 = int_to_ptr.vmem [resolvable:$true] %s363_s29 }
  0x16   : > { %s6794_s24 = scalar_select %p5391_p3, 1, 0 }
  0x17   : > { %p4776_p5 = pneg %p5391_p3 }
  0x18   : > { %6795 = sst [smem:[#allocation28_spill]] %s6794_s24 }
  0x19   : > { %p5400_p6 = pnand %p4776_p5, %p6771_p1 }
  0x1b   : > { %s4887_s13 = scalar_lea.hbm %s6797_s1, 512  ;;  %p5416_p8 = pneg %p5400_p6 }
  0x1c   : > { %p4888_p7 = scmp.ne.s32.totalorder %s6797_s1, %s4887_s13  ;;  %p4894_p11 = scmp.lt.u32.totalorder %s4887_s13, %s6797_s1 }
  0x1e   : > { %p4890_p9 = pnand %p5416_p8, %p4888_p7 }
  0x20   : > { %p4891_p10 = pneg %p4890_p9 }
  0x22   : > { %p4896_p12 = pnand %p4894_p11, %p4891_p10 }
  0x24   : > { %4899 = shalt.err (!%p4896_p12)
}
  0x25   : > { %s4900_s28 = scalar_lea.vmem %s5389_s22, 512  ;;  %p4908_p5 = scmp.lt.s32.totalorder %s5389_s22, %s5389_s22 }
  0x26   : > { %p4901_p13 = scmp.ne.s32.totalorder %s5389_s22, %s4900_s28  ;;  %p4909_p4 = scmp.lt.s32.totalorder %s4900_s28, %s4900_s28 }
  0x28   : > { %p4903_p0 = pnand %p4901_p13, %p5416_p8  ;;  %p4910_p7 = por %p4909_p4, %p4908_p5 }
  0x2a   : > { %p4904_p2 = pneg %p4903_p0 }
  0x2c   : > { %p4911_p9 = pnand %p4910_p7, %p4904_p2 }
  0x2e   : > { %4914 = shalt.err (!%p4911_p9)
}
  0x2f   : > { %s6773_s30 = smov 128   ;;  %s6774_s12 = smov 8  }
  0x30   : > { %4779 = dma.hbm_to_vmem [thread:$0]  (!%p5400_p6), %s6797_s1, 512, %s5389_s22, [#allocation6], %s6773_s30, %s6773_s30, %s6774_s12  }
  0x31   : > { %s6799_s3 = sld [smem:[#allocation32_spill]] }
  0x37   : > { %s4915_s25 = scalar_lea.hbm %s6799_s3, 512 }
  0x38   : > { %p4916_p4 = scmp.ne.s32.totalorder %s6799_s3, %s4915_s25  ;;  %p4922_p12 = scmp.lt.u32.totalorder %s4915_s25, %s6799_s3 }
  0x3a   : > { %p4918_p10 = pnand %p4916_p4, %p5416_p8 }
  0x3c   : > { %p4919_p11 = pneg %p4918_p10 }
  0x3e   : > { %p4924_p13 = pnand %p4922_p12, %p4919_p11 }
  0x40   : > { %4927 = shalt.err (!%p4924_p13)
}
  0x41   : > { %s4928_s22 = scalar_lea.vmem %s5404_s26, 512  ;;  %p4936_p7 = scmp.lt.s32.totalorder %s5404_s26, %s5404_s26 }
  0x42   : > { %p4929_p0 = scmp.ne.s32.totalorder %s5404_s26, %s4928_s22  ;;  %p4937_p9 = scmp.lt.s32.totalorder %s4928_s22, %s4928_s22 }
  0x44   : > { %p4931_p2 = pnand %p4929_p0, %p5416_p8  ;;  %p4938_p4 = por %p4937_p9, %p4936_p7 }
  0x46   : > { %p4932_p5 = pneg %p4931_p2 }
  0x48   : > { %p4939_p10 = pnand %p4938_p4, %p4932_p5 }
  0x4a   : > { %4942 = shalt.err (!%p4939_p10)
}
  0x4b   : > { %4785 = dma.hbm_to_vmem [thread:$0]  (!%p5400_p6), %s6799_s3, 512, %s5404_s26, [#allocation9], %s6773_s30, %s6773_s30, %s6774_s12  }
  0x4c   : > { %s4943_s14 = scalar_lea.hbm %s6761_s5, 896 }
  0x4d   : > { %p4944_p11 = scmp.ne.s32.totalorder %s6761_s5, %s4943_s14  ;;  %p4950_p0 = scmp.lt.u32.totalorder %s4943_s14, %s6761_s5 }
  0x4f   : > { %p4946_p12 = pnand %p4944_p11, %p5416_p8 }
  0x51   : > { %p4947_p13 = pneg %p4946_p12 }
  0x53   : > { %p4952_p2 = pnand %p4950_p0, %p4947_p13 }
  0x55   : > { %4955 = shalt.err (!%p4952_p2)
}
  0x56   : > { %s4956_s26 = scalar_lea.vmem %s5406_s29, 896  ;;  %p4964_p4 = scmp.lt.s32.totalorder %s5406_s29, %s5406_s29 }
  0x57   : > { %p4957_p5 = scmp.ne.s32.totalorder %s5406_s29, %s4956_s26  ;;  %p4965_p10 = scmp.lt.s32.totalorder %s4956_s26, %s4956_s26 }
  0x59   : > { %p4959_p7 = pnand %p4957_p5, %p5416_p8  ;;  %p4966_p11 = por %p4965_p10, %p4964_p4 }
  0x5b   : > { %p4960_p9 = pneg %p4959_p7 }
  0x5d   : > { %p4967_p12 = pnand %p4966_p11, %p4960_p9 }
  0x5f   : > { %4970 = shalt.err (!%p4967_p12)
}
  0x60   : > { %4791 = dma.hbm_to_vmem [thread:$0]  (!%p5400_p6), %s6761_s5, 896, %s5406_s29, [#allocation12], %s6773_s30, %s6773_s30, %s6774_s12  }
  0x61   : > { %s5290_s11 = smov [#allocation14]   ;;  %s5291_s13 = smov [#allocation17]  }
  0x62   : > { %s390_s24 = sshll.u32 %s5290_s11, 4  ;;  %s413_s14 = sshll.u32 %s5291_s13, 4  ;;  %s391_s24 = int_to_ptr.vmem [resolvable:$true] %s390_s24  ;;  %s414_s14 = int_to_ptr.vmem [resolvable:$true] %s413_s14 }
  0x63   : > { %s4971_s25 = scalar_lea.hbm %s6763_s7, 16 }
  0x64   : > { %p4972_p13 = scmp.ne.s32.totalorder %s6763_s7, %s4971_s25  ;;  %p4978_p5 = scmp.lt.u32.totalorder %s4971_s25, %s6763_s7 }
  0x66   : > { %p4974_p0 = pnand %p4972_p13, %p5416_p8 }
  0x68   : > { %p4975_p2 = pneg %p4974_p0 }
  0x6a   : > { %p4980_p7 = pnand %p4978_p5, %p4975_p2 }
  0x6c   : > { %4983 = shalt.err (!%p4980_p7)
}
  0x6d   : > { %s4984_s29 = scalar_lea.vmem %s391_s24, 16  ;;  %s4991_s0 = scalar_lea.vmem %s391_s24, 32 }
  0x6e   : > { %p4985_p9 = scmp.ne.s32.totalorder %s391_s24, %s4984_s29  ;;  %p4992_p11 = scmp.lt.s32.totalorder %s391_s24, %s391_s24 }
  0x6f   : > { %p4993_p12 = scmp.lt.s32.totalorder %s4991_s0, %s4984_s29 }
  0x70   : > { %p4987_p4 = pnand %p4985_p9, %p5416_p8 }
  0x71   : > { %p4994_p1 = por %p4993_p12, %p4992_p11 }
  0x72   : > { %p4988_p10 = pneg %p4987_p4 }
  0x74   : > { %p4995_p3 = pnand %p4994_p1, %p4988_p10 }
  0x76   : > { %4998 = shalt.err (!%p4995_p3)
}
  0x77   : > { %4797 = dma.hbm_to_vmem [thread:$0]  (!%p5400_p6), %s6763_s7, 16, %s391_s24, [#allocation15]  }
  0x78   : > { %s4999_s21 = scalar_lea.hbm %s6765_s9, 512 }
  0x79   : > { %p5000_p13 = scmp.ne.s32.totalorder %s6765_s9, %s4999_s21  ;;  %p5006_p3 = scmp.lt.u32.totalorder %s4999_s21, %s6765_s9 }
  0x7b   : > { %p5002_p0 = pnand %p5000_p13, %p5416_p8 }
  0x7d   : > { %p5003_p1 = pneg %p5002_p0 }
  0x7f   : > { %p5008_p2 = pnand %p5006_p3, %p5003_p1 }
  0x81   : > { %5011 = shalt.err (!%p5008_p2)
}
  0x82   : > { %s5012_s29 = scalar_lea.vmem %s414_s14, 512  ;;  %p5020_p4 = scmp.lt.s32.totalorder %s414_s14, %s414_s14 }
  0x83   : > { %p5013_p5 = scmp.ne.s32.totalorder %s414_s14, %s5012_s29  ;;  %p5021_p10 = scmp.lt.s32.totalorder %s5012_s29, %s5012_s29 }
  0x85   : > { %p5015_p7 = pnand %p5013_p5, %p5416_p8  ;;  %p5022_p11 = por %p5021_p10, %p5020_p4 }
  0x87   : > { %p5016_p9 = pneg %p5015_p7 }
  0x89   : > { %p5023_p12 = pnand %p5022_p11, %p5016_p9 }
  0x8b   : > { %5026 = shalt.err (!%p5023_p12)
}
  0x8c   : > { %4803 = dma.hbm_to_vmem [thread:$0]  (!%p5400_p6), %s6765_s9, 512, %s414_s14, [#allocation18], %s6773_s30, %s6773_s30, %s6774_s12  }
  0x8d   : > { %s5292_s11 = smov [#allocation7]   ;;  %s5293_s1 = smov [#allocation10]  }
  0x8e   : > { %s324_s13 = sshll.u32 %s5292_s11, 4  ;;  %s350_s15 = sshll.u32 %s5293_s1, 4  ;;  %s325_s13 = int_to_ptr.vmem [resolvable:$true] %s324_s13  ;;  %s351_s15 = int_to_ptr.vmem [resolvable:$true] %s350_s15 }
  0x8f   : > { %s6800_s2 = sld [smem:[#allocation31_spill]] }
  0x95   : > { %s5027_s28 = scalar_lea.hbm %s6800_s2, 768 }
  0x96   : > { %p5028_p13 = scmp.ne.s32.totalorder %s6800_s2, %s5027_s28  ;;  %p5034_p3 = scmp.lt.u32.totalorder %s5027_s28, %s6800_s2 }
  0x98   : > { %p5030_p0 = pnand %p5028_p13, %p5416_p8 }
  0x9a   : > { %p5031_p1 = pneg %p5030_p0 }
  0x9c   : > { %p5036_p2 = pnand %p5034_p3, %p5031_p1 }
  0x9e   : > { %5039 = shalt.err (!%p5036_p2)
}
  0x9f   : > { %s5040_s14 = scalar_lea.vmem %s325_s13, 768  ;;  %p5048_p4 = scmp.lt.s32.totalorder %s325_s13, %s325_s13 }
  0xa0   : > { %p5041_p5 = scmp.ne.s32.totalorder %s325_s13, %s5040_s14  ;;  %p5049_p10 = scmp.lt.s32.totalorder %s5040_s14, %s5040_s14 }
  0xa2   : > { %p5043_p7 = pnand %p5041_p5, %p5416_p8  ;;  %p5050_p11 = por %p5049_p10, %p5048_p4 }
  0xa4   : > { %p5044_p9 = pneg %p5043_p7 }
  0xa6   : > { %p5051_p12 = pnand %p5050_p11, %p5044_p9 }
  0xa8   : > { %5054 = shalt.err (!%p5051_p12)
}
  0xa9   : > { %4782 = dma.hbm_to_vmem [thread:$0]  (!%p5400_p6), %s6800_s2, 768, %s325_s13, [#allocation6], %s6773_s30, %s6773_s30, %s6774_s12  }
  0xaa   : > { %s5055_s25 = scalar_lea.hbm %s6760_s4, 512 }
  0xab   : > { %p5056_p13 = scmp.ne.s32.totalorder %s6760_s4, %s5055_s25  ;;  %p5062_p3 = scmp.lt.u32.totalorder %s5055_s25, %s6760_s4 }
  0xad   : > { %p5058_p0 = pnand %p5056_p13, %p5416_p8 }
  0xaf   : > { %p5059_p1 = pneg %p5058_p0 }
  0xb1   : > { %p5064_p2 = pnand %p5062_p3, %p5059_p1 }
  0xb3   : > { %5067 = shalt.err (!%p5064_p2)
}
  0xb4   : > { %s5068_s24 = scalar_lea.vmem %s351_s15, 512  ;;  %p5076_p4 = scmp.lt.s32.totalorder %s351_s15, %s351_s15 }
  0xb5   : > { %p5069_p5 = scmp.ne.s32.totalorder %s351_s15, %s5068_s24  ;;  %p5077_p10 = scmp.lt.s32.totalorder %s5068_s24, %s5068_s24 }
  0xb7   : > { %p5071_p7 = pnand %p5069_p5, %p5416_p8  ;;  %p5078_p11 = por %p5077_p10, %p5076_p4 }
  0xb9   : > { %p5072_p9 = pneg %p5071_p7 }
  0xbb   : > { %p5079_p12 = pnand %p5078_p11, %p5072_p9 }
  0xbd   : > { %5082 = shalt.err (!%p5079_p12)
}
  0xbe   : > { %4788 = dma.hbm_to_vmem [thread:$0]  (!%p5400_p6), %s6760_s4, 512, %s351_s15, [#allocation9], %s6773_s30, %s6773_s30, %s6774_s12  }
  0xbf   : > { %s5294_s0 = smov [#allocation13]   ;;  %s5295_s1 = smov [#allocation16]  }
  0xc0   : > { %s376_s11 = sshll.u32 %s5294_s0, 4  ;;  %s400_s21 = sshll.u32 %s5295_s1, 4  ;;  %s377_s11 = int_to_ptr.vmem [resolvable:$true] %s376_s11  ;;  %s401_s21 = int_to_ptr.vmem [resolvable:$true] %s400_s21 }
  0xc1   : > { %s5083_s26 = scalar_lea.hbm %s6762_s6, 896 }
  0xc2   : > { %p5084_p13 = scmp.ne.s32.totalorder %s6762_s6, %s5083_s26  ;;  %p5090_p3 = scmp.lt.u32.totalorder %s5083_s26, %s6762_s6 }
  0xc4   : > { %p5086_p0 = pnand %p5084_p13, %p5416_p8 }
  0xc6   : > { %p5087_p1 = pneg %p5086_p0 }
  0xc8   : > { %p5092_p2 = pnand %p5090_p3, %p5087_p1 }
  0xca   : > { %5095 = shalt.err (!%p5092_p2)
}
  0xcb   : > { %s5096_s15 = scalar_lea.vmem %s377_s11, 896  ;;  %p5104_p4 = scmp.lt.s32.totalorder %s377_s11, %s377_s11 }
  0xcc   : > { %p5097_p5 = scmp.ne.s32.totalorder %s377_s11, %s5096_s15  ;;  %p5105_p10 = scmp.lt.s32.totalorder %s5096_s15, %s5096_s15 }
  0xce   : > { %p5099_p7 = pnand %p5097_p5, %p5416_p8  ;;  %p5106_p11 = por %p5105_p10, %p5104_p4 }
  0xd0   : > { %p5100_p9 = pneg %p5099_p7 }
  0xd2   : > { %p5107_p12 = pnand %p5106_p11, %p5100_p9 }
  0xd4   : > { %5110 = shalt.err (!%p5107_p12)
}
  0xd5   : > { %4794 = dma.hbm_to_vmem [thread:$0]  (!%p5400_p6), %s6762_s6, 896, %s377_s11, [#allocation12], %s6773_s30, %s6773_s30, %s6774_s12  }
  0xd6   : > { %s5111_s28 = scalar_lea.hbm %s6764_s8, 896 }
  0xd7   : > { %p5112_p13 = scmp.ne.s32.totalorder %s6764_s8, %s5111_s28  ;;  %p5118_p3 = scmp.lt.u32.totalorder %s5111_s28, %s6764_s8 }
  0xd9   : > { %p5114_p0 = pnand %p5112_p13, %p5416_p8 }
  0xdb   : > { %p5115_p1 = pneg %p5114_p0 }
  0xdd   : > { %p5120_p2 = pnand %p5118_p3, %p5115_p1 }
  0xdf   : > { %5123 = shalt.err (!%p5120_p2)
}
  0xe0   : > { %s5124_s13 = scalar_lea.vmem %s401_s21, 896  ;;  %p5132_p4 = scmp.lt.s32.totalorder %s401_s21, %s401_s21 }
  0xe1   : > { %p5125_p5 = scmp.ne.s32.totalorder %s401_s21, %s5124_s13  ;;  %p5133_p10 = scmp.lt.s32.totalorder %s5124_s13, %s5124_s13 }
  0xe3   : > { %p5127_p7 = pnand %p5125_p5, %p5416_p8  ;;  %p5134_p11 = por %p5133_p10, %p5132_p4 }
  0xe5   : > { %p5128_p9 = pneg %p5127_p7 }
  0xe7   : > { %p5135_p12 = pnand %p5134_p11, %p5128_p9 }
  0xe9   : > { %5138 = shalt.err (!%p5135_p12)
}
  0xea   : > { %4800 = dma.hbm_to_vmem [thread:$0]  (!%p5400_p6), %s6764_s8, 896, %s401_s21, [#allocation15], %s6773_s30, %s6773_s30, %s6774_s12  }
  0xeb   : > { %s5296_s14 = smov [#allocation19]   ;;  %s5139_s28 = scalar_lea.hbm %s6766_s10, 16 }
  0xec   : > { %s427_s0 = sshll.u32 %s5296_s14, 4  ;;  %p5140_p13 = scmp.ne.s32.totalorder %s6766_s10, %s5139_s28  ;;  %s428_s0 = int_to_ptr.vmem [resolvable:$true] %s427_s0 }
  0xed   : > { %p5146_p3 = scmp.lt.u32.totalorder %s5139_s28, %s6766_s10 }
  0xee   : > { %p5142_p0 = pnand %p5140_p13, %p5416_p8 }
  0xf0   : > { %p5143_p1 = pneg %p5142_p0 }
  0xf2   : > { %p5148_p2 = pnand %p5146_p3, %p5143_p1 }
  0xf4   : > { %5151 = shalt.err (!%p5148_p2)
}
  0xf5   : > { %s5152_s21 = scalar_lea.vmem %s428_s0, 16  ;;  %s5159_s13 = scalar_lea.vmem %s428_s0, 32 }
  0xf6   : > { %p5153_p5 = scmp.ne.s32.totalorder %s428_s0, %s5152_s21  ;;  %p5160_p4 = scmp.lt.s32.totalorder %s428_s0, %s428_s0 }
  0xf7   : > { %p5161_p10 = scmp.lt.s32.totalorder %s5159_s13, %s5152_s21 }
  0xf8   : > { %p5155_p7 = pnand %p5153_p5, %p5416_p8 }
  0xf9   : > { %p5162_p11 = por %p5161_p10, %p5160_p4 }
  0xfa   : > { %p5156_p9 = pneg %p5155_p7 }
  0xfc   : > { %p5163_p12 = pnand %p5162_p11, %p5156_p9 }
  0xfe   : > { %5166 = shalt.err (!%p5163_p12)
}
  0xff   : > { %4806 = dma.hbm_to_vmem [thread:$0]  (!%p5400_p6), %s6766_s10, 16, %s428_s0, [#allocation18]  }
 0x100   : > { %s3977_s16 = sadd.s32 4294967294, %s5283_s20   ;;  %s5635_s27 = sadd.s32 1, %s5283_s20  }
 0x101   : > { %s36_s14 = ssub.s32 %s5283_s20, %s5635_s27  ;;  %s39_s1 = sadd.s32 1, %s5279_s19 }
 0x102   : > { %p37_p8 = scmp.eq.s32.totalorder %s36_s14, 0  ;;  %p46_p13 = scmp.ne.s32.totalorder %s5279_s19, %s5275_s18 }
 0x103   : > { %p47_p0 = scmp.eq.s32.totalorder %s5283_s20, 0  ;;  %p52_p1 = scmp.ne.s32.totalorder %s5275_s18, %s5271_s17 }
 0x104   : > { %s5646_s25 = scalar_select %p37_p8, %s5279_s19, %s39_s1  }
 0x105   : > { %p48_p3 = por %p47_p0, %p46_p13  ;;  %p6801_p2 = scmp.eq.s32.totalorder %s5384_s23, 0 }
 0x106   : > { %p286_p6 = scmp.eq.s32.totalorder %s5384_s23, 1  ;;  %p292_p7 = scmp.eq.s32.totalorder %s3977_s16, 1 }
 0x107   : > { %p5650_p5 = por %p6801_p2, %p52_p1  ;;  %p4825_p9 = scmp.lt.s32.totalorder %s5283_s20, 2 }
 0x108   : > { %s438_s0 = sand.u32 1, %s5279_s19   ;;  %p5657_p4 = por %p286_p6, %p46_p13 }
 0x109   : > { %p5661_p10 = por %p292_p7, %p52_p1  ;;  %s4729_s29 = smul.u32 384, %s438_s0 }
 0x10a   : > { %s6803_s26 = scalar_select %p5657_p4, 1, 0 }
 0x10b   : > { %s6804_s22 = scalar_select %p5661_p10, 1, 0 }
 0x10c   : > { %s4730_s24 = smul.u32 6144, %s5283_s20  ;;  %p5666_p11 = pnand %p4825_p9, %p48_p3 }
 0x10d   : > { %s6806_s15 = sld [smem:[#allocation29_spill]]  ;;  %s442_s14 = scalar_lea.vmem [#allocation2], %s4729_s29 }
 0x10e   : > { %s450_s1 = sshll.u32 %s442_s14, 4  ;;  %s5677_s30 = scalar_lea.sflag [#allocation3], %s438_s0  ;;  %s5675_s1 = int_to_ptr.vmem [resolvable:$true] %s450_s1 }
 0x10f   : > { %p5169_p8 = pneg %p5666_p11 }
 0x113   : > { %s5673_s16 = scalar_lea.hbm %s6806_s15, %s4730_s24  ;;  %s5172_s11 = scalar_lea.hbm %s6806_s15, 12288 }
 0x114   : > { %s5167_s12 = scalar_lea.hbm %s5673_s16, 6144  ;;  %p5173_p1 = scmp.lt.u32.totalorder %s5673_s16, %s6806_s15 }
 0x115   : > { %p5168_p12 = scmp.ne.s32.totalorder %s5673_s16, %s5167_s12  ;;  %p5174_p3 = scmp.lt.u32.totalorder %s5172_s11, %s5167_s12 }
 0x116   : > { %p5176_p6 = scmp.lt.u32.totalorder %s5167_s12, %s5673_s16 }
 0x117   : > { %p5170_p13 = pnand %p5169_p8, %p5168_p12  ;;  %p5175_p2 = por %p5174_p3, %p5173_p1 }
 0x119   : > { %p5171_p0 = pneg %p5170_p13  ;;  %p5177_p7 = por %p5176_p6, %p5175_p2 }
 0x11b   : > { %p5178_p9 = pnand %p5177_p7, %p5171_p0 }
 0x11d   : > { %5181 = shalt.err (!%p5178_p9)
}
 0x11e   : > { %s5182_s0 = scalar_lea.vmem %s5675_s1, 6144  ;;  %s5297_s29 = smov [#allocation2]  }
 0x11f   : > { %p5183_p12 = scmp.ne.s32.totalorder %s5675_s1, %s5182_s0  ;;  %s5187_s14 = sshll.u32 %s5297_s29, 4  ;;  %s5188_s14 = int_to_ptr.vmem [resolvable:$false] %s5187_s14 }
 0x120   : > { %s5189_s2 = scalar_lea.vmem %s5188_s14, 12288  ;;  %p5190_p4 = scmp.lt.s32.totalorder %s5675_s1, %s5188_s14 }
 0x121   : > { %p5185_p13 = pnand %p5183_p12, %p5169_p8  ;;  %p5191_p1 = scmp.lt.s32.totalorder %s5189_s2, %s5182_s0 }
 0x123   : > { %p5186_p10 = pneg %p5185_p13  ;;  %p5192_p3 = por %p5191_p1, %p5190_p4 }
 0x125   : > { %p5193_p2 = pnand %p5192_p3, %p5186_p10 }
 0x127   : > { %5196 = shalt.err (!%p5193_p2)
}
 0x128   : > { %s6807_s3 = smov 8   ;;  %s6808_s12 = smov 128  }
 0x129   : > { %4810 = dma.hbm_to_vmem [thread:$0]  (!%p5666_p11), %s5673_s16, 6144, %s5675_s1, %s5677_s30, %s6808_s12, %s6808_s12, %s6807_s3  }
 0x12a   : > { %s6809_s24 = sld [smem:[#allocation28_spill]] }
 0x130   : > { %p6810_p8 = scmp.ne.s32.totalorder %s6809_s24, 0 }
 0x131   : > { %s5711_s13 = sand.u32 (!%p6810_p8), 1, %s5275_s18  }
 0x132   : > { %462 = sbr.rel (%p6810_p8) target bundleno = 2086 (0x826), region = 64  ;;  %s465_s0 = scalar_lea.sflag (!%p6810_p8), [#allocation3], %s5711_s13 }
 0x133   : > { %s4731_s11 = smul.u32 (!%p6810_p8), 384, %s5711_s13 }
 0x135   : > { %s5715_s29 = scalar_lea.vmem (!%p6810_p8), [#allocation2], %s4731_s11 }
 0x139   : > { %5242 = dma.done.wait (%p5650_p5), %s465_s0, 6144  }
 0x13a   : > { %5244 = vsyncadd (%p5650_p5), %s465_s0, 4294961152  ;;  %p6811_p4 = scmp.eq.s32.totalorder %s5384_s23, 0 }
 0x13c   : > { %5246 = dma.done.wait (%p6811_p4), [#allocation6], 1280   ;;  %p6812_p10 = pmov %p6811_p4 }
 0x13d   : > { %p6813_p11 = pmov %p6811_p4 }
 0x13e   : > { %5248 = vsyncadd (%p6812_p10), [#allocation6], 4294966016 }
 0x13f   : > { %5250 = dma.done.wait (%p6813_p11), [#allocation9], 1024   ;;  %p6814_p0 = pmov %p6811_p4 }
 0x141   : > { %5252 = vsyncadd (%p6814_p0), [#allocation9], 4294966272  ;;  %p6815_p6 = pmov %p6814_p0 }
 0x142   : > { %p6816_p7 = pmov %p6814_p0 }
 0x143   : > { %5254 = dma.done.wait (%p6815_p6), [#allocation12], 1792  }
 0x144   : > { %5256 = vsyncadd (%p6816_p7), [#allocation12], 4294965504  ;;  %p6817_p5 = pmov %p6814_p0 }
 0x145   : > { %p6818_p9 = pmov %p6814_p0 }
 0x146   : > { %5258 = dma.done.wait (%p6817_p5), [#allocation15], 912  }
 0x147   : > { %5260 = vsyncadd (%p6818_p9), [#allocation15], 4294966384  ;;  %p6819_p12 = pmov %p6814_p0 }
 0x148   : > { %p6820_p13 = pmov %p6814_p0 }
 0x149   : > { %5262 = dma.done.wait (%p6819_p12), [#allocation18], 528  }
 0x14a   : > { %5264 = vsyncadd (%p6820_p13), [#allocation18], 4294966768  ;;  %vm600_vm0 = vcmask 261120   ;;  %v596_v0 = vld [vmem:[#allocation5] sm:$0xff]  ;;  %v597_v1 = vld [vmem:[#allocation5 + $0x8] sm:$0xff]  ;;  %vm1316_vm1 = vcmask 392192  }
 0x14b   : > { %v598_v2 = vld [vmem:[#allocation5 + $0x10] sm:$0xff]  ;;  %v4679_v3 = vpack.c.bf16 %v597_v1, %v596_v0  ;;  %v599_v4 = vld [vmem:[#allocation5 + $0x18] sm:$0xff]  ;;  %v548_v5 = vld [vmem:[%s5715_s29] sm:$0xff]  ;;  %vm1709_vm2 = vcmask 457728   ;;  %vm5300_vm3 = vmmov 0   ;;  %vm3562_vm4 = vcmask 130112  }
 0x14c   : > { %v4683_v6 = vpack.c.bf16 %v599_v4, %v598_v2  ;;  %4382 = vmatprep.mubr.msk.f32.mxu0 %vm600_vm0, %v548_v5  ;;  %v549_v7 = vld [vmem:[%s5715_s29 + $0x8] sm:$0xff]  ;;  %v550_v8 = vld [vmem:[%s5715_s29 + $0x10] sm:$0xff]  ;;  %v579_v10 = vld [vmem:[%s5715_s29 + $0xf8] sm:$0xff]  ;;  %vm3569_vm5 = vcmask 195712   ;;  %vm3576_vm6 = vcmask 261312   ;;  %vm3711_vm7 = vcmask 1041409  }
 0x14d   : > { %4680 = vmatprep.subr.bf16.mxu0 %v4679_v3  ;;  %4725 = vmatprep.subr.bf16.mxu1 %v4679_v3  ;;  %v578_v9 = vld [vmem:[%s5715_s29 + $0xf0] sm:$0xff]  ;;  %v580_v11 = vld [vmem:[%s5715_s29 + $0x100] sm:$0xff]  ;;  %v551_v12 = vld [vmem:[%s5715_s29 + $0x18] sm:$0xff]  ;;  %vm3713_vm8 = vcmask 1042434   ;;  %vm3715_vm9 = vcmask 1043459   ;;  %vm3717_vm10 = vcmask 1044484  }
 0x14e   : > { %4682 = vmatpush3.bf16.msra.mxu0 %v4679_v3  ;;  %4727 = vmatpush3.bf16.msra.mxu1 %v4679_v3  ;;  %v552_v13 = vld [vmem:[%s5715_s29 + $0x20] sm:$0xff]  ;;  %v581_v14 = vld [vmem:[%s5715_s29 + $0x108] sm:$0xff]  ;;  %v582_v15 = vld [vmem:[%s5715_s29 + $0x110] sm:$0xff]  ;;  %vm3719_vm11 = vcmask 1045509   ;;  %vm3721_vm12 = vcmask 1046534   ;;  %vm3723_vm13 = vcmask 1047559  }
 0x14f   : > { %4684 = vmatprep.subr.bf16.mxu0 %v4683_v6  ;;  %4726 = vmatprep.subr.bf16.mxu1 %v4683_v6  ;;  %v553_v16 = vld [vmem:[%s5715_s29 + $0x28] sm:$0xff]  ;;  %v554_v17 = vld [vmem:[%s5715_s29 + $0x30] sm:$0xff]  ;;  %v583_v18 = vld [vmem:[%s5715_s29 + $0x118] sm:$0xff]  ;;  %s4004_s30 = sshll.u32 %s5711_s13, 3  ;;  %s4177_s28 = sshll.u32 %s5384_s23, 7 }
 0x150   : > { %4427 = vmatprep.mubr.msk.f32.mxu1 %vm600_vm0, %v578_v9  ;;  %v584_v19 = vld [vmem:[%s5715_s29 + $0x120] sm:$0xff]  ;;  %v555_v20 = vld [vmem:[%s5715_s29 + $0x38] sm:$0xff]  ;;  %v585_v22 = vld [vmem:[%s5715_s29 + $0x128] sm:$0xff]  ;;  %s546_s21 = scalar_lea.vmem [#allocation20], %s4004_s30  ;;  %s6834_s2 = sld [smem:[#allocation33_spill]] }
 0x151   : > { %v556_v21 = vld [vmem:[%s5715_s29 + $0x40] sm:$0xff]  ;;  %v586_v23 = vld [vmem:[%s5715_s29 + $0x130] sm:$0xff]  ;;  %v557_v24 = vld [vmem:[%s5715_s29 + $0x48] sm:$0xff]  ;;  %s3812_s16 = sshll.u32 %s546_s21, 4  ;;  %s3799_s12 = scalar_lea.sflag [#allocation4], %s5711_s13  ;;  %s6714_s16 = int_to_ptr.vmem [resolvable:$true] %s3812_s16 }
 0x152   : > { %4686 = vmatpush3.bf16.msra.mxu0 %v4683_v6  ;;  %4728 = vmatpush3.bf16.msra.mxu1 %v4683_v6  ;;  %v558_v25 = vld [vmem:[%s5715_s29 + $0x50] sm:$0xff]  ;;  %v587_v26 = vld [vmem:[%s5715_s29 + $0x138] sm:$0xff]  ;;  %v588_v27 = vld [vmem:[%s5715_s29 + $0x140] sm:$0xff]  ;;  %s5197_s24 = scalar_lea.vmem %s6714_s16, 128  ;;  %p6835_p3 = scmp.ne.s32.totalorder %s6803_s26, 0 }
 0x153   : > { %v559_v28 = vld [vmem:[%s5715_s29 + $0x58] sm:$0xff]  ;;  %v560_v29 = vld [vmem:[%s5715_s29 + $0x60] sm:$0xff]  ;;  %v589_v30 = vld [vmem:[%s5715_s29 + $0x148] sm:$0xff]  ;;  %p5198_p1 = scmp.ne.s32.totalorder %s6714_s16, %s5197_s24  ;;  %s5302_s23 = smov [#allocation20]  }
 0x154   : > { %v590_v31 = vld [vmem:[%s5715_s29 + $0x150] sm:$0xff]  ;;  %v561_v32 = vld [vmem:[%s5715_s29 + $0x68] sm:$0xff]  ;;  %v591_v34 = vld [vmem:[%s5715_s29 + $0x158] sm:$0xff]  ;;  %s5201_s11 = sshll.u32 %s5302_s23, 4  ;;  %s5202_s11 = int_to_ptr.vmem [resolvable:$false] %s5201_s11 }
 0x155   : > { %4383 = vmatmul.mubr.msk.f32.vlgmr.msra.gmra.mrb[0].mxu0 %vm600_vm0, %v549_v7  ;;  %4428 = vmatmul.mubr.msk.f32.vlgmr.msra.gmra.mrb[0].mxu1 %vm600_vm0, %v579_v10  ;;  %v562_v33 = vld [vmem:[%s5715_s29 + $0x70] sm:$0xff]  ;;  %v592_v35 = vld [vmem:[%s5715_s29 + $0x160] sm:$0xff]  ;;  %v563_v36 = vld [vmem:[%s5715_s29 + $0x78] sm:$0xff]  ;;  %p5199_p2 = pnand %p5198_p1, %p6835_p3  ;;  %s5203_s0 = scalar_lea.vmem %s5202_s11, 256 }
 0x156   : > { %4385 = vmatprep.mubr.msk.f32.mxu0 %vm600_vm0, %v550_v8  ;;  %4430 = vmatprep.mubr.msk.f32.mxu1 %vm600_vm0, %v580_v11  ;;  %v564_v37 = vld [vmem:[%s5715_s29 + $0x80] sm:$0xff]  ;;  %v593_v38 = vld [vmem:[%s5715_s29 + $0x168] sm:$0xff]  ;;  %v594_v39 = vld [vmem:[%s5715_s29 + $0x170] sm:$0xff]  ;;  %s6712_s3 = scalar_lea.hbm %s6834_s2, %s4177_s28  ;;  %p5204_p4 = scmp.lt.s32.totalorder %s6714_s16, %s5202_s11 }
 0x157   : > { %v565_v40 = vld [vmem:[%s5715_s29 + $0x88] sm:$0xff]  ;;  %v566_v41 = vld [vmem:[%s5715_s29 + $0x90] sm:$0xff]  ;;  %v595_v42 = vld [vmem:[%s5715_s29 + $0x178] sm:$0xff]  ;;  %p5200_p8 = pneg %p5199_p2  ;;  %p5205_p10 = scmp.lt.s32.totalorder %s5203_s0, %s5197_s24 }
 0x158   : > { %v567_v43 = vld [vmem:[%s5715_s29 + $0x98] sm:$0xff]  ;;  %v568_v44 = vld [vmem:[%s5715_s29 + $0xa0] sm:$0xff]  ;;  %v569_v45 = vld [vmem:[%s5715_s29 + $0xa8] sm:$0xff] }
 0x159   : > { %4386 = vmatmul.mubr.msk.f32.gmra.mrb[2].mxu0 %vm600_vm0, %v551_v12  ;;  %4431 = vmatmul.mubr.msk.f32.gmra.mrb[2].mxu1 %vm600_vm0, %v581_v14  ;;  %v570_v46 = vld [vmem:[%s5715_s29 + $0xb0] sm:$0xff]  ;;  %v571_v47 = vld [vmem:[%s5715_s29 + $0xb8] sm:$0xff]  ;;  %v572_v48 = vld [vmem:[%s5715_s29 + $0xc0] sm:$0xff]  ;;  %p5206_p11 = por %p5205_p10, %p5204_p4 }
 0x15a   : > { %4388 = vmatprep.mubr.msk.f32.mxu0 %vm600_vm0, %v552_v13  ;;  %4433 = vmatprep.mubr.msk.f32.mxu1 %vm600_vm0, %v582_v15  ;;  %v573_v49 = vld [vmem:[%s5715_s29 + $0xc8] sm:$0xff]  ;;  %v574_v50 = vld [vmem:[%s5715_s29 + $0xd0] sm:$0xff]  ;;  %v575_v51 = vld [vmem:[%s5715_s29 + $0xd8] sm:$0xff] }
 0x15b   : > { %v576_v52 = vld [vmem:[%s5715_s29 + $0xe0] sm:$0xff]  ;;  %v577_v53 = vld [vmem:[%s5715_s29 + $0xe8] sm:$0xff]  ;;  %v1308_v57 = vld [vmem:[#allocation7 + $0x10] sm:$0xff]  ;;  %p5207_p0 = pnand %p5206_p11, %p5200_p8 }
 0x15c   : > { %v1306_v54 = vld [vmem:[#allocation7] sm:$0xff]  ;;  %v1307_v55 = vld [vmem:[#allocation7 + $0x8] sm:$0xff]  ;;  %v1309_v58 = vld [vmem:[#allocation7 + $0x18] sm:$0xff] }
 0x15d   : > { %4389 = vmatmul.mubr.msk.f32.gmra.mrb[4].mxu0 %vm600_vm0, %v553_v16  ;;  %4434 = vmatmul.mubr.msk.f32.gmra.mrb[4].mxu1 %vm600_vm0, %v583_v18  ;;  %v4687_v56 = vpack.c.bf16 %v1307_v55, %v1306_v54  ;;  %v1310_v59 = vld [vmem:[#allocation7 + $0x20] sm:$0xff]  ;;  %v4691_v60 = vpack.c.bf16 %v1309_v58, %v1308_v57  ;;  %v1311_v61 = vld [vmem:[#allocation7 + $0x28] sm:$0xff]  ;;  %v1810_v55 = vld [vmem:[#allocation11 + $0x20] sm:$0xff] }
 0x15e   : > { %4391 = vmatprep.mubr.msk.f32.mxu0 %vm600_vm0, %v554_v17  ;;  %4436 = vmatprep.mubr.msk.f32.mxu1 %vm600_vm0, %v584_v19  ;;  %v4695_v62 = vpack.c.bf16 %v1311_v61, %v1310_v59  ;;  %v1812_v61 = vld [vmem:[#allocation11 + $0x30] sm:$0xff] }
 0x15f   : > { %4688 = vmatprep.subr.bf16.mxu1 %v4687_v56 }
 0x160   : > { %4690 = vmatpush3.bf16.msra.mxu1 %v4687_v56  ;;  %v1811_v56 = vld [vmem:[#allocation11 + $0x28] sm:$0xff] }
 0x161   : > { %4392 = vmatmul.mubr.msk.f32.gmra.mrb[6].mxu0 %vm600_vm0, %v555_v20  ;;  %4437 = vmatmul.mubr.msk.f32.gmra.mrb[6].mxu1 %vm600_vm0, %v585_v22  ;;  %v4707_v57 = vpack.c.bf16 %v1811_v56, %v1810_v55 }
 0x162   : > { %4394 = vmatprep.mubr.msk.f32.mxu0 %vm600_vm0, %v556_v21  ;;  %4439 = vmatprep.mubr.msk.f32.mxu1 %vm600_vm0, %v586_v23 }
 0x163   : > { %4692 = vmatprep.subr.bf16.mxu1 %v4691_v60 }
 0x164   : > { %4694 = vmatpush3.bf16.msra.mxu1 %v4691_v60 }
 0x165   : > { %4395 = vmatmul.mubr.msk.f32.gmra.mrb[8].mxu0 %vm600_vm0, %v557_v24  ;;  %4440 = vmatmul.mubr.msk.f32.gmra.mrb[8].mxu1 %vm600_vm0, %v587_v26 }
 0x166   : > { %4397 = vmatprep.mubr.msk.f32.mxu0 %vm600_vm0, %v558_v25  ;;  %4442 = vmatprep.mubr.msk.f32.mxu1 %vm600_vm0, %v588_v27 }
 0x167   : > { %4696 = vmatprep.subr.bf16.mxu1 %v4695_v62 }
 0x168   : > { %4698 = vmatpush3.bf16.msra.mxu1 %v4695_v62 }
 0x169   : > { %4398 = vmatmul.mubr.msk.f32.gmra.mrb[10].mxu0 %vm600_vm0, %v559_v28  ;;  %4443 = vmatmul.mubr.msk.f32.gmra.mrb[10].mxu1 %vm600_vm0, %v589_v30 }
 0x16a   : > { %4400 = vmatprep.mubr.msk.f32.mxu0 %vm600_vm0, %v560_v29  ;;  %4445 = vmatprep.mubr.msk.f32.mxu1 %vm600_vm0, %v590_v31 }
 0x16d   : > { %4401 = vmatmul.mubr.msk.f32.gmra.mrb[12].mxu0 %vm600_vm0, %v561_v32  ;;  %4446 = vmatmul.mubr.msk.f32.gmra.mrb[12].mxu1 %vm600_vm0, %v591_v34 }
 0x16e   : > { %4403 = vmatprep.mubr.msk.f32.mxu0 %vm600_vm0, %v562_v33  ;;  %4448 = vmatprep.mubr.msk.f32.mxu1 %vm600_vm0, %v592_v35 }
 0x171   : > { %4404 = vmatmul.mubr.msk.f32.gmra.mrb[14].mxu0 %vm600_vm0, %v563_v36  ;;  %4449 = vmatmul.mubr.msk.f32.gmra.mrb[14].mxu1 %vm600_vm0, %v593_v38 }
 0x172   : > { %4406 = vmatprep.mubr.msk.f32.mxu0 %vm600_vm0, %v564_v37  ;;  %4451 = vmatprep.mubr.msk.f32.mxu1 %vm600_vm0, %v594_v39 }
 0x175   : > { %4407 = vmatmul.mubr.msk.f32.gmra.mrb[16].mxu0 %vm600_vm0, %v565_v40  ;;  %4452 = vmatmul.mubr.msk.f32.gmra.mrb[16].mxu1 %vm600_vm0, %v595_v42 }
 0x176   : > { %4409 = vmatprep.mubr.msk.f32.mxu0 %vm600_vm0, %v566_v41 }
 0x179   : > { %4410 = vmatmul.mubr.msk.f32.gmra.mrb[18].mxu0 %vm600_vm0, %v567_v43 }
 0x17a   : > { %4412 = vmatprep.mubr.msk.f32.mxu0 %vm600_vm0, %v568_v44 }
 0x17d   : > { %4413 = vmatmul.mubr.msk.f32.gmra.mrb[20].mxu0 %vm600_vm0, %v569_v45 }
 0x17e   : > { %4415 = vmatprep.mubr.msk.f32.mxu0 %vm600_vm0, %v570_v46 }
 0x181   : > { %4416 = vmatmul.mubr.msk.f32.gmra.mrb[22].mxu0 %vm600_vm0, %v571_v47  ;;  %v1806_v47 = vld [vmem:[#allocation11] sm:$0xff] }
 0x182   : > { %4418 = vmatprep.mubr.msk.f32.mxu0 %vm600_vm0, %v572_v48  ;;  %v1807_v48 = vld [vmem:[#allocation11 + $0x8] sm:$0xff] }
 0x185   : > { %4419 = vmatmul.mubr.msk.f32.gmra.mrb[24].mxu0 %vm600_vm0, %v573_v49  ;;  %v4699_v49 = vpack.c.bf16 %v1807_v48, %v1806_v47 }
 0x186   : > { %4421 = vmatprep.mubr.msk.f32.mxu0 %vm600_vm0, %v574_v50 }
 0x187   : > { %4700 = vmatprep.subr.bf16.mxu1 %v4699_v49 }
 0x189   : > { %4422 = vmatmul.mubr.msk.f32.gmra.mrb[26].mxu0 %vm600_vm0, %v575_v51  ;;  %v1808_v51 = vld [vmem:[#allocation11 + $0x10] sm:$0xff] }
 0x18a   : > { %4424 = vmatprep.mubr.msk.f32.mxu0 %vm600_vm0, %v576_v52  ;;  %v1809_v52 = vld [vmem:[#allocation11 + $0x18] sm:$0xff] }
 0x18d   : > { %4425 = vmatmul.mubr.msk.f32.gmra.mrb[28].mxu0 %vm600_vm0, %v577_v53  ;;  %v4703_v53 = vpack.c.bf16 %v1809_v52, %v1808_v51 }
 0x228   : > { %v4384_v63 = vpop.f32.mrb[0].mxu0  ;;  %v5837_v1 = vpop.f32.mrb[0].mxu1 }
 0x229   : > { %v811_v0 = vpop.f32.mrb[1].mxu0  ;;  %v5839_v2 = vpop.f32.mrb[1].mxu1 }
 0x22a   : > { %1050 = vxpose.xlu0.b32.start [1/6] (short) (narrow) %v811_v0, 32 }
 0x22c   : > { %v4387_v3 = vpop.f32.mrb[2].mxu0  ;;  %v5841_v5 = vpop.f32.mrb[2].mxu1 }
 0x22d   : > { %v821_v4 = vpop.f32.mrb[3].mxu0  ;;  %v5843_v6 = vpop.f32.mrb[3].mxu1 }
 0x22e   : > { %1051 = vxpose.xlu0.b32.cont [2/6] (short) (narrow) %v4384_v63, 32 }
 0x230   : > { %v4390_v7 = vpop.f32.mrb[4].mxu0  ;;  %v5845_v9 = vpop.f32.mrb[4].mxu1 }
 0x231   : > { %v831_v8 = vpop.f32.mrb[5].mxu0  ;;  %v5847_v10 = vpop.f32.mrb[5].mxu1 }
 0x232   : > { %1052 = vxpose.xlu0.b32.cont [3/6] (short) (narrow) %v821_v4, 32 }
 0x234   : > { %v4393_v11 = vpop.f32.mrb[6].mxu0  ;;  %v5849_v13 = vpop.f32.mrb[6].mxu1 }
 0x235   : > { %v841_v12 = vpop.f32.mrb[7].mxu0  ;;  %v991_v14 = vpop.f32.mrb[7].mxu1 }
 0x236   : > { %1053 = vxpose.xlu0.b32.cont [4/6] (short) (narrow) %v4387_v3, 32  ;;  %1082 = vxpose.xlu1.b32.start [1/6] (short) (narrow) %v841_v12, 32 }
 0x238   : > { %v4396_v15 = vpop.f32.mrb[8].mxu0  ;;  %v5851_v17 = vpop.f32.mrb[8].mxu1 }
 0x239   : > { %v851_v16 = vpop.f32.mrb[9].mxu0  ;;  %v1001_v18 = vpop.f32.mrb[9].mxu1 }
 0x23a   : > { %1054 = vxpose.xlu0.b32.cont [5/6] (short) (narrow) %v831_v8, 32  ;;  %1083 = vxpose.xlu1.b32.cont [2/6] (short) (narrow) %v4393_v11, 32 }
 0x23c   : > { %v4399_v19 = vpop.f32.mrb[10].mxu0  ;;  %v4444_v21 = vpop.f32.mrb[10].mxu1 }
 0x23d   : > { %v861_v20 = vpop.f32.mrb[11].mxu0  ;;  %v1011_v22 = vpop.f32.mrb[11].mxu1 }
 0x23e   : > { %1055 = vxpose.xlu0.b32.end [6/6] (short) (narrow) %v4390_v7, 32  ;;  %1084 = vxpose.xlu1.b32.cont [3/6] (short) (narrow) %v851_v16, 32 }
 0x240   : > { %v4402_v23 = vpop.f32.mrb[12].mxu0  ;;  %v4447_v25 = vpop.f32.mrb[12].mxu1 }
 0x241   : > { %v871_v24 = vpop.f32.mrb[13].mxu0  ;;  %v1021_v26 = vpop.f32.mrb[13].mxu1 }
 0x242   : > { %1085 = vxpose.xlu1.b32.cont [4/6] (short) (narrow) %v4396_v15, 32  ;;  %1114 = vxpose.xlu0.b32.start [1/6] (short) (narrow) %v871_v24, 32 }
 0x244   : > { %v4405_v27 = vpop.f32.mrb[14].mxu0  ;;  %v4450_v29 = vpop.f32.mrb[14].mxu1 }
 0x245   : > { %v881_v28 = vpop.f32.mrb[15].mxu0  ;;  %v1031_v30 = vpop.f32.mrb[15].mxu1 }
 0x246   : > { %1086 = vxpose.xlu1.b32.cont [5/6] (short) (narrow) %v861_v20, 32  ;;  %1115 = vxpose.xlu0.b32.cont [2/6] (short) (narrow) %v4402_v23, 32 }
 0x248   : > { %v4408_v31 = vpop.f32.mrb[16].mxu0  ;;  %v4453_v33 = vpop.f32.mrb[16].mxu1 }
 0x249   : > { %v891_v32 = vpop.f32.mrb[17].mxu0  ;;  %v1041_v34 = vpop.f32.mrb[17].mxu1 }
 0x24a   : > { %1087 = vxpose.xlu1.b32.end [6/6] (short) (narrow) %v4399_v19, 32  ;;  %1116 = vxpose.xlu0.b32.cont [3/6] (short) (narrow) %v881_v28, 32 }
 0x24c   : > { %v4411_v35 = vpop.f32.mrb[18].mxu0 }
 0x24d   : > { %v901_v36 = vpop.f32.mrb[19].mxu0 }
 0x24e   : > { %1117 = vxpose.xlu0.b32.cont [4/6] (short) (narrow) %v4405_v27, 32  ;;  %1146 = vxpose.xlu1.b32.start [1/6] (short) (narrow) %v901_v36, 32 }
 0x250   : > { %v4414_v37 = vpop.f32.mrb[20].mxu0 }
 0x251   : > { %v911_v38 = vpop.f32.mrb[21].mxu0 }
 0x252   : > { %1118 = vxpose.xlu0.b32.cont [5/6] (short) (narrow) %v891_v32, 32  ;;  %1147 = vxpose.xlu1.b32.cont [2/6] (short) (narrow) %v4411_v35, 32 }
 0x254   : > { %v4417_v39 = vpop.f32.mrb[22].mxu0 }
 0x255   : > { %v921_v40 = vpop.f32.mrb[23].mxu0 }
 0x256   : > { %1119 = vxpose.xlu0.b32.end [6/6] (short) (narrow) %v4408_v31, 32  ;;  %1148 = vxpose.xlu1.b32.cont [3/6] (short) (narrow) %v911_v38, 32 }
 0x258   : > { %v4420_v41 = vpop.f32.mrb[24].mxu0 }
 0x259   : > { %v931_v42 = vpop.f32.mrb[25].mxu0 }
 0x25a   : > { %1149 = vxpose.xlu1.b32.cont [4/6] (short) (narrow) %v4414_v37, 32  ;;  %1178 = vxpose.xlu0.b32.start [1/6] (short) (narrow) %v931_v42, 32 }
 0x25c   : > { %v4423_v43 = vpop.f32.mrb[26].mxu0 }
 0x25d   : > { %v941_v44 = vpop.f32.mrb[27].mxu0 }
 0x25e   : > { %1150 = vxpose.xlu1.b32.cont [5/6] (short) (narrow) %v921_v40, 32  ;;  %1179 = vxpose.xlu0.b32.cont [2/6] (short) (narrow) %v4420_v41, 32 }
 0x260   : > { %v4426_v45 = vpop.f32.mrb[28].mxu0 }
 0x261   : > { %v951_v46 = vpop.f32.mrb[29].mxu0 }
 0x262   : > { %1151 = vxpose.xlu1.b32.end [6/6] (short) (narrow) %v4417_v39, 32  ;;  %1180 = vxpose.xlu0.b32.cont [3/6] (short) (narrow) %v941_v44, 32 }
 0x266   : > { %1210 = vxpose.xlu1.b32.start [1/6] (short) (narrow) %v5839_v2, 32  ;;  %1181 = vxpose.xlu0.b32.cont [4/6] (short) (narrow) %v4423_v43, 32 }
 0x26a   : > { %1211 = vxpose.xlu1.b32.cont [2/6] (short) (narrow) %v5837_v1, 32  ;;  %1182 = vxpose.xlu0.b32.cont [5/6] (short) (narrow) %v951_v46, 32 }
 0x26e   : > { %1212 = vxpose.xlu1.b32.cont [3/6] (short) (narrow) %v5843_v6, 32  ;;  %1183 = vxpose.xlu0.b32.end [6/6] (short) (narrow) %v4426_v45, 32 }
 0x272   : > { %1213 = vxpose.xlu1.b32.cont [4/6] (short) (narrow) %v5841_v5, 32  ;;  %1242 = vxpose.xlu0.b32.start [1/6] (short) (narrow) %v991_v14, 32 }
 0x276   : > { %1214 = vxpose.xlu1.b32.cont [5/6] (short) (narrow) %v5847_v10, 32  ;;  %1243 = vxpose.xlu0.b32.cont [2/6] (short) (narrow) %v5849_v13, 32 }
 0x27a   : > { %1215 = vxpose.xlu1.b32.end [6/6] (short) (narrow) %v5845_v9, 32  ;;  %1244 = vxpose.xlu0.b32.cont [3/6] (short) (narrow) %v1001_v18, 32 }
 0x27e   : > { %1245 = vxpose.xlu0.b32.cont [4/6] (short) (narrow) %v5851_v17, 32  ;;  %1274 = vxpose.xlu1.b32.start [1/6] (short) (narrow) %v1021_v26, 32  ;;  %v5895_v26 = vld [vmem:[#allocation8] sm:$0xff] }
 0x282   : > { %1246 = vxpose.xlu0.b32.cont [5/6] (short) (narrow) %v1011_v22, 32  ;;  %1275 = vxpose.xlu1.b32.cont [2/6] (short) (narrow) %v4447_v25, 32  ;;  %v5893_v25 = vld [vmem:[#allocation8 + $0x8] sm:$0xff] }
 0x286   : > { %1247 = vxpose.xlu0.b32.end [6/6] (short) (narrow) %v4444_v21, 32  ;;  %1276 = vxpose.xlu1.b32.cont [3/6] (short) (narrow) %v1031_v30, 32 }
 0x28a   : > { %1277 = vxpose.xlu1.b32.cont [4/6] (short) (narrow) %v4450_v29, 32 }
 0x28e   : > { %1278 = vxpose.xlu1.b32.cont [5/6] (short) (narrow) %v1041_v34, 32  ;;  %v5913_v34 = vld [vmem:[#allocation8 + $0x10] sm:$0xff] }
 0x292   : > { %1279 = vxpose.xlu1.b32.end [6/6] (short) (narrow) %v4453_v33, 32  ;;  %v5908_v33 = vld [vmem:[#allocation8 + $0x18] sm:$0xff] }
 0x2aa   : > { %v1066_v50 = vpop.trf.xlu0 }
 0x2ab   : > { %4466 = vmatprep.mubr.msk.f32.mxu1 %vm1316_vm1, %v1066_v50 }
 0x2ae   : > { %v1067_v54 = vpop.trf.xlu0 }
 0x2af   : > { %4467 = vmatmul.mubr.msk.f32.vlgmr.msra.gmra.mrb[18].mxu1 %vm1316_vm1, %v1067_v54 }
 0x2b0   : > { %4702 = vmatpush3.bf16.msra.mxu1 %v4699_v49 }
 0x2b1   : > { %4704 = vmatprep.subr.bf16.mxu1 %v4703_v53 }
 0x2b2   : > { %v1068_v58 = vpop.trf.xlu0 }
 0x2b3   : > { %4469 = vmatprep.mubr.msk.f32.mxu1 %vm1316_vm1, %v1068_v58 }
 0x2b4   : > { %4706 = vmatpush3.bf16.msra.mxu1 %v4703_v53 }
 0x2b5   : > { %4708 = vmatprep.subr.bf16.mxu1 %v4707_v57 }
 0x2b6   : > { %v1069_v59 = vpop.trf.xlu0  ;;  %v1098_v60 = vpop.trf.xlu1 }
 0x2b7   : > { %4470 = vmatmul.mubr.msk.f32.gmra.mrb[20].mxu1 %vm1316_vm1, %v1069_v59 }
 0x2b8   : > { %4472 = vmatprep.mubr.msk.f32.mxu1 %vm1316_vm1, %v1098_v60  ;;  %4710 = vmatpush3.bf16.msra.mxu1 %v4707_v57 }
 0x2b9   : > { %4526 = vmatprep.subr.mxu1 %v1812_v61 }
 0x2ba   : > { %v1099_v62 = vpop.trf.xlu1 }
 0x2bb   : > { %4473 = vmatmul.mubr.msk.f32.gmra.mrb[22].mxu1 %vm1316_vm1, %v1099_v62 }
 0x2bc   : > { %4527 = vmatpush3.msra.mxu1 %v1812_v61 }
 0x2be   : > { %v1100_v63 = vpop.trf.xlu1 }
 0x2bf   : > { %4475 = vmatprep.mubr.msk.f32.mxu1 %vm1316_vm1, %v1100_v63 }
 0x2c2   : > { %v1101_v0 = vpop.trf.xlu1  ;;  %v1130_v1 = vpop.trf.xlu0 }
 0x2c3   : > { %4476 = vmatmul.mubr.msk.f32.gmra.mrb[24].mxu1 %vm1316_vm1, %v1101_v0 }
 0x2c4   : > { %4478 = vmatprep.mubr.msk.f32.mxu1 %vm1316_vm1, %v1130_v1 }
 0x2c6   : > { %v1131_v2 = vpop.trf.xlu0 }
 0x2c7   : > { %4479 = vmatmul.mubr.msk.f32.gmra.mrb[26].mxu1 %vm1316_vm1, %v1131_v2 }
 0x2ca   : > { %v1132_v3 = vpop.trf.xlu0 }
 0x2cb   : > { %4481 = vmatprep.mubr.msk.f32.mxu1 %vm1316_vm1, %v1132_v3 }
 0x2ce   : > { %v1133_v4 = vpop.trf.xlu0  ;;  %v1162_v5 = vpop.trf.xlu1 }
 0x2cf   : > { %4482 = vmatmul.mubr.msk.f32.gmra.mrb[28].mxu1 %vm1316_vm1, %v1133_v4 }
 0x2d0   : > { %4484 = vmatprep.mubr.msk.f32.mxu1 %vm1316_vm1, %v1162_v5 }
 0x2d2   : > { %v1163_v6 = vpop.trf.xlu1 }
 0x2d3   : > { %4485 = vmatmul.mubr.msk.f32.gmra.mrb[30].mxu1 %vm1316_vm1, %v1163_v6 }
 0x2d6   : > { %v1164_v7 = vpop.trf.xlu1 }
 0x2d7   : > { %4487 = vmatprep.mubr.msk.f32.mxu1 %vm1316_vm1, %v1164_v7 }
 0x2da   : > { %v1165_v8 = vpop.trf.xlu1  ;;  %v1194_v9 = vpop.trf.xlu0 }
 0x2db   : > { %4488 = vmatmul.mubr.msk.f32.gmra.mrb[32].mxu1 %vm1316_vm1, %v1165_v8 }
 0x2dc   : > { %4490 = vmatprep.mubr.msk.f32.mxu1 %vm1316_vm1, %v1194_v9 }
 0x2de   : > { %v1195_v10 = vpop.trf.xlu0 }
 0x2df   : > { %4491 = vmatmul.mubr.msk.f32.gmra.mrb[34].mxu1 %vm1316_vm1, %v1195_v10 }
 0x2e2   : > { %v1196_v11 = vpop.trf.xlu0 }
 0x2e3   : > { %4493 = vmatprep.mubr.msk.f32.mxu1 %vm1316_vm1, %v1196_v11 }
 0x2e6   : > { %v1226_v12 = vpop.trf.xlu1  ;;  %v1197_v13 = vpop.trf.xlu0 }
 0x2e7   : > { %4494 = vmatmul.mubr.msk.f32.gmra.mrb[36].mxu1 %vm1316_vm1, %v1197_v13 }
 0x2e8   : > { %4496 = vmatprep.mubr.msk.f32.mxu1 %vm1316_vm1, %v1226_v12 }
 0x2ea   : > { %v1227_v14 = vpop.trf.xlu1 }
 0x2eb   : > { %4497 = vmatmul.mubr.msk.f32.gmra.mrb[38].mxu1 %vm1316_vm1, %v1227_v14 }
 0x2ee   : > { %v1228_v15 = vpop.trf.xlu1 }
 0x2ef   : > { %4499 = vmatprep.mubr.msk.f32.mxu1 %vm1316_vm1, %v1228_v15 }
 0x2f2   : > { %v1229_v16 = vpop.trf.xlu1  ;;  %v1258_v17 = vpop.trf.xlu0 }
 0x2f3   : > { %4500 = vmatmul.mubr.msk.f32.gmra.mrb[40].mxu1 %vm1316_vm1, %v1229_v16 }
 0x2f4   : > { %4502 = vmatprep.mubr.msk.f32.mxu1 %vm1316_vm1, %v1258_v17 }
 0x2f6   : > { %v1259_v18 = vpop.trf.xlu0 }
 0x2f7   : > { %4503 = vmatmul.mubr.msk.f32.gmra.mrb[42].mxu1 %vm1316_vm1, %v1259_v18 }
 0x2fa   : > { %v1260_v19 = vpop.trf.xlu0 }
 0x2fb   : > { %4505 = vmatprep.mubr.msk.f32.mxu1 %vm1316_vm1, %v1260_v19 }
 0x2fe   : > { %v1290_v20 = vpop.trf.xlu1  ;;  %v1261_v21 = vpop.trf.xlu0 }
 0x2ff   : > { %4506 = vmatmul.mubr.msk.f32.gmra.mrb[44].mxu1 %vm1316_vm1, %v1261_v21 }
 0x300   : > { %4508 = vmatprep.mubr.msk.f32.mxu1 %vm1316_vm1, %v1290_v20 }
 0x302   : > { %v1291_v22 = vpop.trf.xlu1 }
 0x303   : > { %4509 = vmatmul.mubr.msk.f32.gmra.mrb[46].mxu1 %vm1316_vm1, %v1291_v22 }
 0x306   : > { %v1292_v23 = vpop.trf.xlu1 }
 0x307   : > { %4511 = vmatprep.mubr.msk.f32.mxu1 %vm1316_vm1, %v1292_v23 }
 0x30a   : > { %v1293_v24 = vpop.trf.xlu1 }
 0x30b   : > { %4512 = vmatmul.mubr.msk.f32.gmra.mrb[48].mxu1 %vm1316_vm1, %v1293_v24 }
 0x382   : > { %v4468_v27 = vpop.f32.mrb[18].mxu1 }
 0x383   : > { %v5898_v28 = vadd.f32 %v4468_v27, %v5893_v25  ;;  %v1479_v29 = vpop.f32.mrb[19].mxu1 }
 0x384   : > { %v5901_v30 = vadd.f32 %v1479_v29, %v5895_v26 }
 0x385   : > { %v1639_v32 = vmax.f32 %v5898_v28, 0.0 }
 0x386   : > { %v1638_v31 = vmax.f32 %v5901_v30, 0.0 }
 0x388   : > { %4528 = vmatprep.mubr.msk.f32.mxu1 %vm1709_vm2, %v1638_v31 }
 0x389   : > { %4529 = vmatmul.mubr.msk.f32.vlgmr.msra.gmra.mrb[50].mxu1 %vm1709_vm2, %v1639_v32 }
 0x38a   : > { %v4471_v35 = vpop.f32.mrb[20].mxu1 }
 0x38b   : > { %v5916_v36 = vadd.f32 %v4471_v35, %v5908_v33  ;;  %v1489_v37 = vpop.f32.mrb[21].mxu1 }
 0x38c   : > { %v5919_v38 = vadd.f32 %v1489_v37, %v5913_v34 }
 0x38d   : > { %v1641_v41 = vmax.f32 %v5916_v36, 0.0 }
 0x38e   : > { %v1640_v39 = vmax.f32 %v5919_v38, 0.0  ;;  %v4474_v40 = vpop.f32.mrb[22].mxu1 }
 0x38f   : > { %v5924_v42 = vadd.f32 %v4474_v40, %v5893_v25  ;;  %v1499_v43 = vpop.f32.mrb[23].mxu1 }
 0x390   : > { %v5927_v44 = vadd.f32 %v1499_v43, %v5895_v26  ;;  %4531 = vmatprep.mubr.msk.f32.mxu1 %vm1709_vm2, %v1640_v39 }
 0x391   : > { %v1643_v45 = vmax.f32 %v5924_v42, 0.0  ;;  %4532 = vmatmul.mubr.msk.f32.gmra.mrb[52].mxu1 %vm1709_vm2, %v1641_v41 }
 0x392   : > { %v1642_v46 = vmax.f32 %v5927_v44, 0.0 }
 0x394   : > { %4534 = vmatprep.mubr.msk.f32.mxu1 %vm1709_vm2, %v1642_v46 }
 0x395   : > { %4535 = vmatmul.mubr.msk.f32.gmra.mrb[54].mxu1 %vm1709_vm2, %v1643_v45 }
 0x396   : > { %v4477_v47 = vpop.f32.mrb[24].mxu1 }
 0x397   : > { %v5944_v48 = vadd.f32 %v4477_v47, %v5908_v33  ;;  %v1509_v49 = vpop.f32.mrb[25].mxu1 }
 0x398   : > { %v5947_v50 = vadd.f32 %v1509_v49, %v5913_v34 }
 0x399   : > { %v1645_v51 = vmax.f32 %v5944_v48, 0.0 }
 0x39a   : > { %v1644_v52 = vmax.f32 %v5947_v50, 0.0  ;;  %v4480_v53 = vpop.f32.mrb[26].mxu1 }
 0x39b   : > { %v5952_v54 = vadd.f32 %v4480_v53, %v5893_v25  ;;  %v1519_v55 = vpop.f32.mrb[27].mxu1 }
 0x39c   : > { %v5955_v56 = vadd.f32 %v1519_v55, %v5895_v26  ;;  %4537 = vmatprep.mubr.msk.f32.mxu1 %vm1709_vm2, %v1644_v52 }
 0x39d   : > { %v1647_v57 = vmax.f32 %v5952_v54, 0.0  ;;  %4538 = vmatmul.mubr.msk.f32.gmra.mrb[56].mxu1 %vm1709_vm2, %v1645_v51 }
 0x39e   : > { %v1646_v58 = vmax.f32 %v5955_v56, 0.0 }
 0x3a0   : > { %4540 = vmatprep.mubr.msk.f32.mxu1 %vm1709_vm2, %v1646_v58 }
 0x3a1   : > { %4541 = vmatmul.mubr.msk.f32.gmra.mrb[58].mxu1 %vm1709_vm2, %v1647_v57 }
 0x3a2   : > { %v4483_v59 = vpop.f32.mrb[28].mxu1 }
 0x3a3   : > { %v5972_v60 = vadd.f32 %v4483_v59, %v5908_v33  ;;  %v1529_v61 = vpop.f32.mrb[29].mxu1 }
 0x3a4   : > { %v5975_v62 = vadd.f32 %v1529_v61, %v5913_v34 }
 0x3a5   : > { %v1649_v63 = vmax.f32 %v5972_v60, 0.0 }
 0x3a6   : > { %v1648_v0 = vmax.f32 %v5975_v62, 0.0  ;;  %v4486_v1 = vpop.f32.mrb[30].mxu1 }
 0x3a7   : > { %v5980_v2 = vadd.f32 %v4486_v1, %v5893_v25  ;;  %v1539_v3 = vpop.f32.mrb[31].mxu1 }
 0x3a8   : > { %v5983_v4 = vadd.f32 %v1539_v3, %v5895_v26  ;;  %4543 = vmatprep.mubr.msk.f32.mxu1 %vm1709_vm2, %v1648_v0 }
 0x3a9   : > { %v1651_v5 = vmax.f32 %v5980_v2, 0.0  ;;  %4544 = vmatmul.mubr.msk.f32.gmra.mrb[60].mxu1 %vm1709_vm2, %v1649_v63 }
 0x3aa   : > { %v1650_v6 = vmax.f32 %v5983_v4, 0.0 }
 0x3ac   : > { %4546 = vmatprep.mubr.msk.f32.mxu1 %vm1709_vm2, %v1650_v6 }
 0x3ad   : > { %4547 = vmatmul.mubr.msk.f32.gmra.mrb[62].mxu1 %vm1709_vm2, %v1651_v5 }
 0x3ae   : > { %v4489_v7 = vpop.f32.mrb[32].mxu1 }
 0x3af   : > { %v6000_v8 = vadd.f32 %v4489_v7, %v5908_v33  ;;  %v1549_v9 = vpop.f32.mrb[33].mxu1 }
 0x3b0   : > { %v6003_v10 = vadd.f32 %v1549_v9, %v5913_v34 }
 0x3b1   : > { %v1653_v11 = vmax.f32 %v6000_v8, 0.0 }
 0x3b2   : > { %v1652_v12 = vmax.f32 %v6003_v10, 0.0  ;;  %v4492_v13 = vpop.f32.mrb[34].mxu1 }
 0x3b3   : > { %v6008_v14 = vadd.f32 %v4492_v13, %v5893_v25  ;;  %v1559_v15 = vpop.f32.mrb[35].mxu1 }
 0x3b4   : > { %v6011_v16 = vadd.f32 %v1559_v15, %v5895_v26  ;;  %4549 = vmatprep.mubr.msk.f32.mxu1 %vm1709_vm2, %v1652_v12 }
 0x3b5   : > { %v6787_v17 = vmax.f32 %v6008_v14, 0.0  ;;  %4550 = vmatmul.mubr.msk.f32.gmra.mrb[64].mxu1 %vm1709_vm2, %v1653_v11  ;;  %v6821_v10 = vmax.f32 %v6008_v14, 0.0 }
 0x3b6   : > { %v1654_v18 = vmax.f32 %v6011_v16, 0.0 }
 0x3b8   : > { %4552 = vmatprep.mubr.msk.f32.mxu1 %vm1709_vm2, %v1654_v18 }
 0x3b9   : > { %4553 = vmatmul.mubr.msk.f32.gmra.mrb[66].mxu1 %vm1709_vm2, %v6787_v17 }
 0x3ba   : > { %v4495_v19 = vpop.f32.mrb[36].mxu1 }
 0x3bb   : > { %v6028_v20 = vadd.f32 %v4495_v19, %v5908_v33  ;;  %v1569_v21 = vpop.f32.mrb[37].mxu1 }
 0x3bc   : > { %v6031_v22 = vadd.f32 %v1569_v21, %v5913_v34 }
 0x3bd   : > { %v1657_v23 = vmax.f32 %v6028_v20, 0.0 }
 0x3be   : > { %v6784_v24 = vmax.f32 %v6031_v22, 0.0  ;;  %v4498_v27 = vpop.f32.mrb[38].mxu1  ;;  %v6823_v14 = vmax.f32 %v6031_v22, 0.0 }
 0x3bf   : > { %v6036_v29 = vadd.f32 %v4498_v27, %v5893_v25  ;;  %v1579_v35 = vpop.f32.mrb[39].mxu1 }
 0x3c0   : > { %v6039_v37 = vadd.f32 %v1579_v35, %v5895_v26  ;;  %4555 = vmatprep.mubr.msk.f32.mxu1 %vm1709_vm2, %v6784_v24 }
 0x3c1   : > { %v6777_v40 = vmax.f32 %v6036_v29, 0.0  ;;  %4556 = vmatmul.mubr.msk.f32.gmra.mrb[68].mxu1 %vm1709_vm2, %v1657_v23  ;;  %v6825_v22 = vmax.f32 %v6036_v29, 0.0 }
 0x3c2   : > { %v1658_v43 = vmax.f32 %v6039_v37, 0.0 }
 0x3c4   : > { %4558 = vmatprep.mubr.msk.f32.mxu1 %vm1709_vm2, %v1658_v43 }
 0x3c5   : > { %4559 = vmatmul.mubr.msk.f32.gmra.mrb[70].mxu1 %vm1709_vm2, %v6777_v40 }
 0x3c6   : > { %v4501_v47 = vpop.f32.mrb[40].mxu1 }
 0x3c7   : > { %v6056_v49 = vadd.f32 %v4501_v47, %v5908_v33  ;;  %v1589_v53 = vpop.f32.mrb[41].mxu1 }
 0x3c8   : > { %v6059_v55 = vadd.f32 %v1589_v53, %v5913_v34 }
 0x3c9   : > { %v6783_v59 = vmax.f32 %v6056_v49, 0.0 }
 0x3ca   : > { %v6776_v61 = vmax.f32 %v6059_v55, 0.0  ;;  %v4504_v1 = vpop.f32.mrb[42].mxu1  ;;  %v6827_v29 = vmax.f32 %v6059_v55, 0.0 }
 0x3cb   : > { %v6064_v3 = vadd.f32 %v4504_v1, %v5893_v25  ;;  %v1599_v7 = vpop.f32.mrb[43].mxu1 }
 0x3cc   : > { %v6067_v9 = vadd.f32 %v1599_v7, %v5895_v26  ;;  %4561 = vmatprep.mubr.msk.f32.mxu1 %vm1709_vm2, %v6776_v61 }
 0x3cd   : > { %v6779_v13 = vmax.f32 %v6064_v3, 0.0  ;;  %4562 = vmatmul.mubr.msk.f32.gmra.mrb[72].mxu1 %vm1709_vm2, %v6783_v59  ;;  %v6829_v55 = vmax.f32 %v6064_v3, 0.0 }
 0x3ce   : > { %v6786_v15 = vmax.f32 %v6067_v9, 0.0  ;;  %v6822_v20 = vmax.f32 %v6067_v9, 0.0  ;;  %v6824_v9 = vmax.f32 %v6056_v49, 0.0 }
 0x3d0   : > { %4564 = vmatprep.mubr.msk.f32.mxu1 %vm1709_vm2, %v6786_v15 }
 0x3d1   : > { %4565 = vmatmul.mubr.msk.f32.gmra.mrb[74].mxu1 %vm1709_vm2, %v6779_v13 }
 0x3d2   : > { %v4507_v19 = vpop.f32.mrb[44].mxu1 }
 0x3d3   : > { %v6084_v21 = vadd.f32 %v4507_v19, %v5908_v33  ;;  %v1609_v27 = vpop.f32.mrb[45].mxu1 }
 0x3d4   : > { %v6087_v35 = vadd.f32 %v1609_v27, %v5913_v34 }
 0x3d5   : > { %v6781_v47 = vmax.f32 %v6084_v21, 0.0 }
 0x3d6   : > { %v6778_v53 = vmax.f32 %v6087_v35, 0.0  ;;  %v4510_v1 = vpop.f32.mrb[46].mxu1 }
 0x3d7   : > { %v6092_v7 = vadd.f32 %v4510_v1, %v5893_v25  ;;  %v1619_v61 = vpop.f32.mrb[47].mxu1 }
 0x3d8   : > { %v6095_v40 = vadd.f32 %v1619_v61, %v5895_v26  ;;  %4567 = vmatprep.mubr.msk.f32.mxu1 %vm1709_vm2, %v6778_v53 }
 0x3d9   : > { %v6780_v19 = vmax.f32 %v6092_v7, 0.0  ;;  %4568 = vmatmul.mubr.msk.f32.gmra.mrb[76].mxu1 %vm1709_vm2, %v6781_v47  ;;  %v2391_v47 = vld [vmem:[#allocation10 + $0x8] sm:$0xff] }
 0x3da   : > { %v6782_v27 = vmax.f32 %v6095_v40, 0.0  ;;  %v6826_v49 = vmax.f32 %v6095_v40, 0.0  ;;  %v6828_v40 = vmax.f32 %v6084_v21, 0.0 }
 0x3dc   : > { %4570 = vmatprep.mubr.msk.f32.mxu1 %vm1709_vm2, %v6782_v27 }
 0x3dd   : > { %4571 = vmatmul.mubr.msk.f32.gmra.mrb[78].mxu1 %vm1709_vm2, %v6780_v19  ;;  %v2390_v19 = vld [vmem:[#allocation10] sm:$0xff] }
 0x3de   : > { %v4513_v25 = vpop.f32.mrb[48].mxu1 }
 0x3df   : > { %v6112_v26 = vadd.f32 %v4513_v25, %v5908_v33  ;;  %v1629_v61 = vpop.f32.mrb[49].mxu1  ;;  %v4711_v33 = vpack.c.bf16 %v2391_v47, %v2390_v19  ;;  %v2392_v25 = vld [vmem:[#allocation10 + $0x10] sm:$0xff] }
 0x3e0   : > { %v6115_v1 = vadd.f32 %v1629_v61, %v5913_v34  ;;  %v2393_v34 = vld [vmem:[#allocation10 + $0x18] sm:$0xff] }
 0x3e1   : > { %v6788_v53 = vmax.f32 %v6112_v26, 0.0  ;;  %4712 = vmatprep.subr.bf16.mxu0 %v4711_v33  ;;  %v4715_v61 = vpack.c.bf16 %v2393_v34, %v2392_v25  ;;  %v6830_v21 = vmax.f32 %v6112_v26, 0.0 }
 0x3e2   : > { %v6785_v13 = vmax.f32 %v6115_v1, 0.0  ;;  %4714 = vmatpush3.bf16.msra.mxu0 %v4711_v33 }
 0x3e3   : > { %4716 = vmatprep.subr.bf16.mxu0 %v4715_v61 }
 0x3e4   : > { %4573 = vmatprep.mubr.msk.f32.mxu1 %vm1709_vm2, %v6785_v13 }
 0x3e5   : > { %4574 = vmatmul.mubr.msk.f32.gmra.mrb[80].mxu1 %vm1709_vm2, %v6788_v53 }
 0x3e6   : > { %4718 = vmatpush3.bf16.msra.mxu0 %v4715_v61 }
 0x45c   : > { %v4530_v27 = vpop.f32.mrb[50].mxu1 }
 0x45d   : > { %v1975_v59 = vpop.f32.mrb[51].mxu1 }
 0x45e   : > { %2134 = vxpose.xlu0.b32.start [1/4] (short) (narrow) %v1975_v59, 56 }
 0x462   : > { %2135 = vxpose.xlu0.b32.cont [2/4] (short) (narrow) %v4530_v27, 56 }
 0x464   : > { %v4533_v24 = vpop.f32.mrb[52].mxu1 }
 0x465   : > { %v1985_v13 = vpop.f32.mrb[53].mxu1 }
 0x466   : > { %2136 = vxpose.xlu0.b32.cont [3/4] (short) (narrow) %v1985_v13, 56 }
 0x468   : > { %v4536_v15 = vpop.f32.mrb[54].mxu1 }
 0x469   : > { %v1995_v17 = vpop.f32.mrb[55].mxu1 }
 0x46a   : > { %2137 = vxpose.xlu0.b32.end [4/4] (short) (narrow) %v4533_v24, 56  ;;  %2166 = vxpose.xlu1.b32.start [1/4] (short) (narrow) %v1995_v17, 56 }
 0x46e   : > { %2167 = vxpose.xlu1.b32.cont [2/4] (short) (narrow) %v4536_v15, 56 }
 0x470   : > { %v4539_v47 = vpop.f32.mrb[56].mxu1 }
 0x471   : > { %v2005_v19 = vpop.f32.mrb[57].mxu1 }
 0x472   : > { %2168 = vxpose.xlu1.b32.cont [3/4] (short) (narrow) %v2005_v19, 56 }
 0x474   : > { %v4542_v33 = vpop.f32.mrb[58].mxu1 }
 0x475   : > { %v2015_v53 = vpop.f32.mrb[59].mxu1 }
 0x476   : > { %2169 = vxpose.xlu1.b32.end [4/4] (short) (narrow) %v4539_v47, 56 }
 0x477   : > { %2198 = vxpose.xlu0.b32.start [1/4] (short) (narrow) %v2015_v53, 56 }
 0x47b   : > { %2199 = vxpose.xlu0.b32.cont [2/4] (short) (narrow) %v4542_v33, 56 }
 0x47c   : > { %v4545_v25 = vpop.f32.mrb[60].mxu1 }
 0x47d   : > { %v2025_v34 = vpop.f32.mrb[61].mxu1 }
 0x47f   : > { %2200 = vxpose.xlu0.b32.cont [3/4] (short) (narrow) %v2025_v34, 56 }
 0x480   : > { %v4548_v59 = vpop.f32.mrb[62].mxu1 }
 0x481   : > { %v2035_v27 = vpop.f32.mrb[63].mxu1 }
 0x483   : > { %2201 = vxpose.xlu0.b32.end [4/4] (short) (narrow) %v4545_v25, 56  ;;  %2230 = vxpose.xlu1.b32.start [1/4] (short) (narrow) %v2035_v27, 56 }
 0x487   : > { %2231 = vxpose.xlu1.b32.cont [2/4] (short) (narrow) %v4548_v59, 56 }
 0x488   : > { %v4551_v13 = vpop.f32.mrb[64].mxu1 }
 0x489   : > { %v2045_v24 = vpop.f32.mrb[65].mxu1 }
 0x48b   : > { %2232 = vxpose.xlu1.b32.cont [3/4] (short) (narrow) %v2045_v24, 56 }
 0x48c   : > { %v4554_v17 = vpop.f32.mrb[66].mxu1 }
 0x48d   : > { %v2055_v15 = vpop.f32.mrb[67].mxu1 }
 0x48f   : > { %2233 = vxpose.xlu1.b32.end [4/4] (short) (narrow) %v4551_v13, 56 }
 0x490   : > { %2262 = vxpose.xlu0.b32.start [1/4] (short) (narrow) %v2055_v15, 56 }
 0x494   : > { %2263 = vxpose.xlu0.b32.cont [2/4] (short) (narrow) %v4554_v17, 56  ;;  %v4557_v61 = vpop.f32.mrb[68].mxu1 }
 0x495   : > { %v2065_v47 = vpop.f32.mrb[69].mxu1 }
 0x498   : > { %2264 = vxpose.xlu0.b32.cont [3/4] (short) (narrow) %v2065_v47, 56  ;;  %v4560_v53 = vpop.f32.mrb[70].mxu1 }
 0x499   : > { %v2075_v19 = vpop.f32.mrb[71].mxu1 }
 0x49c   : > { %2265 = vxpose.xlu0.b32.end [4/4] (short) (narrow) %v4557_v61, 56  ;;  %2294 = vxpose.xlu1.b32.start [1/4] (short) (narrow) %v2075_v19, 56 }
 0x4a0   : > { %2295 = vxpose.xlu1.b32.cont [2/4] (short) (narrow) %v4560_v53, 56  ;;  %v4563_v33 = vpop.f32.mrb[72].mxu1  ;;  %v5298_v53 = vmov 0  }
 0x4a1   : > { %v2085_v25 = vpop.f32.mrb[73].mxu1 }
 0x4a4   : > { %2296 = vxpose.xlu1.b32.cont [3/4] (short) (narrow) %v2085_v25, 56  ;;  %v4566_v34 = vpop.f32.mrb[74].mxu1  ;;  %v2970_v25 = vld [vmem:[#allocation16] sm:$0xff] }
 0x4a5   : > { %v2095_v59 = vpop.f32.mrb[75].mxu1 }
 0x4a8   : > { %2297 = vxpose.xlu1.b32.end [4/4] (short) (narrow) %v4563_v33, 56 }
 0x4a9   : > { %2326 = vxpose.xlu0.b32.start [1/4] (short) (narrow) %v2095_v59, 56 }
 0x4ac   : > { %v4569_v27 = vpop.f32.mrb[76].mxu1 }
 0x4ad   : > { %2327 = vxpose.xlu0.b32.cont [2/4] (short) (narrow) %v4566_v34, 56  ;;  %v2105_v13 = vpop.f32.mrb[77].mxu1  ;;  %v2971_v34 = vld [vmem:[#allocation16 + $0x8] sm:$0xff] }
 0x4b0   : > { %v4572_v24 = vpop.f32.mrb[78].mxu1 }
 0x4b1   : > { %2328 = vxpose.xlu0.b32.cont [3/4] (short) (narrow) %v2105_v13, 56  ;;  %v2115_v17 = vpop.f32.mrb[79].mxu1  ;;  %v2975_v13 = vld [vmem:[#allocation16 + $0x28] sm:$0xff] }
 0x4b5   : > { %2329 = vxpose.xlu0.b32.end [4/4] (short) (narrow) %v4569_v27, 56  ;;  %2358 = vxpose.xlu1.b32.start [1/4] (short) (narrow) %v2115_v17, 56 }
 0x4b8   : > { %v4575_v15 = vpop.f32.mrb[80].mxu1 }
 0x4b9   : > { %2359 = vxpose.xlu1.b32.cont [2/4] (short) (narrow) %v4572_v24, 56  ;;  %v2125_v61 = vpop.f32.mrb[81].mxu1  ;;  %v2972_v24 = vld [vmem:[#allocation16 + $0x10] sm:$0xff] }
 0x4bd   : > { %2360 = vxpose.xlu1.b32.cont [3/4] (short) (narrow) %v2125_v61, 56  ;;  %v2973_v61 = vld [vmem:[#allocation16 + $0x18] sm:$0xff] }
 0x4c1   : > { %2361 = vxpose.xlu1.b32.end [4/4] (short) (narrow) %v4575_v15, 56 }
 0x4de   : > { %v2150_v47 = vpop.trf.xlu0  ;;  %4885 = vset.pattern.permute.xlu0 %v5298_v53 }
 0x4df   : > { %4584 = vmatprep.mubr.msk.f32.mxu0 %vm600_vm0, %v2150_v47  ;;  %4886 = vset.pattern.permute.xlu1 %v5298_v53 }
 0x4e2   : > { %v2151_v19 = vpop.trf.xlu0 }
 0x4e3   : > { %4585 = vmatmul.mubr.msk.f32.vlgmr.msra.gmra.mrb[30].mxu0 %vm600_vm0, %v2151_v19  ;;  %v2974_v19 = vld [vmem:[#allocation16 + $0x20] sm:$0xff] }
 0x4e6   : > { %v2152_v33 = vpop.trf.xlu0 }
 0x4e7   : > { %4587 = vmatprep.mubr.msk.f32.mxu0 %vm600_vm0, %v2152_v33 }
 0x4ea   : > { %v2153_v59 = vpop.trf.xlu0  ;;  %2979 = vperm.xlu0 %4885, %v2970_v25   ;;  %v2182_v27 = vpop.trf.xlu1 }
 0x4eb   : > { %4588 = vmatmul.mubr.msk.f32.gmra.mrb[32].mxu0 %vm600_vm0, %v2153_v59  ;;  %2984 = vperm.xlu1 %4886, %v2971_v34   ;;  %v2976_v34 = vld [vmem:[#allocation16 + $0x30] sm:$0xff] }
 0x4ee   : > { %v2154_v17 = vpop.trf.xlu0  ;;  %3004 = vperm.xlu0 %4885, %v2975_v13   ;;  %v2183_v15 = vpop.trf.xlu1 }
 0x4ef   : > { %4590 = vmatprep.mubr.msk.f32.mxu0 %vm600_vm0, %v2154_v17  ;;  %2989 = vperm.xlu1 %4886, %v2972_v24  }
 0x4f2   : > { %v2155_v47 = vpop.trf.xlu0  ;;  %v2184_v53 = vpop.trf.xlu1 }
 0x4f3   : > { %4591 = vmatmul.mubr.msk.f32.gmra.mrb[34].mxu0 %vm600_vm0, %v2155_v47  ;;  %2994 = vperm.xlu1 %4886, %v2973_v61  }
 0x4f6   : > { %v2156_v33 = vpop.trf.xlu0  ;;  %v2185_v25 = vpop.trf.xlu1 }
 0x4f7   : > { %4593 = vmatprep.mubr.msk.f32.mxu0 %vm600_vm0, %v2156_v33  ;;  %2999 = vperm.xlu1 %4886, %v2974_v19  }
 0x4f8   : > { %4594 = vmatmul.mubr.msk.f32.gmra.mrb[36].mxu0 %vm600_vm0, %v2182_v27  ;;  %v6139_v27 = vld [vmem:[#allocation14] ss:$0 sm:$0xff] }
 0x4f9   : > { %4596 = vmatprep.mubr.msk.f32.mxu0 %vm600_vm0, %v2183_v15  ;;  %v1683_v44 = vmul.f32 %v6139_v27, %v1644_v52  ;;  %v1678_v50 = vmul.f32 %v6139_v27, %v1639_v32  ;;  %v1689_v48 = vmul.f32 %v6139_v27, %v1650_v6  ;;  %v1685_v38 = vmul.f32 %v6139_v27, %v1646_v58 }
 0x4fa   : > { %v2214_v59 = vpop.trf.xlu0  ;;  %v2186_v13 = vpop.trf.xlu1  ;;  %v1688_v4 = vmul.f32 %v6139_v27, %v1649_v63  ;;  %v1680_v56 = vmul.f32 %v6139_v27, %v1641_v41  ;;  %v1693_v60 = vmul.f32 %v6139_v27, %v1654_v18  ;;  %v1687_v36 = vmul.f32 %v6139_v27, %v1648_v0 }
 0x4fb   : > { %3009 = vperm.xlu1 %4886, %v2976_v34   ;;  %v1713_v32 = vsel %vm1709_vm2, %v1678_v50, 0.0  ;;  %v1746_v6 = vsel %vm1709_vm2, %v1689_v48, 0.0  ;;  %v1692_v16 = vmul.f32 %v6139_v27, %v1653_v11  ;;  %v1690_v62 = vmul.f32 %v6139_v27, %v1651_v5 }
 0x4fc   : > { %4597 = vmatmul.mubr.msk.f32.gmra.mrb[38].mxu0 %vm600_vm0, %v2184_v53  ;;  %v1677_v53 = vmul.f32 %v6139_v27, %v1638_v31  ;;  %v1682_v31 = vmul.f32 %v6139_v27, %v1643_v45  ;;  %v1686_v45 = vmul.f32 %v6139_v27, %v1647_v57  ;;  %v1679_v57 = vmul.f32 %v6139_v27, %v1640_v39 }
 0x4fd   : > { %4599 = vmatprep.mubr.msk.f32.mxu0 %vm600_vm0, %v2185_v25  ;;  %v1743_v63 = vsel %vm1709_vm2, %v1688_v4, 0.0  ;;  %v1758_v18 = vsel %vm1709_vm2, %v1693_v60, 0.0  ;;  %v1697_v8 = vmul.f32 %v6139_v27, %v1658_v43  ;;  %v1755_v11 = vsel %vm1709_vm2, %v1692_v16, 0.0 }
 0x4fe   : > { %v2215_v24 = vpop.trf.xlu0  ;;  %v2187_v17 = vpop.trf.xlu1  ;;  %v1710_v34 = vsel %vm1709_vm2, %v1677_v53, 0.0  ;;  %v1684_v53 = vmul.f32 %v6139_v27, %v1645_v51  ;;  %v1737_v54 = vsel %vm1709_vm2, %v1686_v45, 0.0  ;;  %v1691_v2 = vmul.f32 %v6139_v27, %v1652_v12 }
 0x4ff   : > { %v1696_v37 = vmul.f32 %v6139_v27, %v1657_v23  ;;  %v1770_v43 = vsel %vm1709_vm2, %v1697_v8, 0.0  ;;  %v1694_v12 = vmul.f32 %v6139_v27, %v6821_v10  ;;  %v1701_v23 = vmul.f32 %v6139_v27, %v6822_v20 }
 0x500   : > { %4600 = vmatmul.mubr.msk.f32.gmra.mrb[40].mxu0 %vm600_vm0, %v2186_v13  ;;  %v1731_v51 = vsel %vm1709_vm2, %v1684_v53, 0.0  ;;  %v1700_v53 = vmul.f32 %v6139_v27, %v6824_v9  ;;  %v1705_v48 = vmul.f32 %v6139_v27, %v6826_v49  ;;  %v1704_v4 = vmul.f32 %v6139_v27, %v6828_v40 }
 0x501   : > { %4602 = vmatprep.mubr.msk.f32.mxu0 %vm600_vm0, %v2187_v17  ;;  %v1767_v45 = vsel %vm1709_vm2, %v1696_v37, 0.0  ;;  %v1708_v60 = vmul.f32 %v6139_v27, %v6830_v21  ;;  %v6832_v16 = vmax.f32 %v6092_v7, 0.0 }
 0x502   : > { %v2216_v61 = vpop.trf.xlu0  ;;  %v2188_v47 = vpop.trf.xlu1 }
 0x503   : > { %v1803_v26 = vsel %vm1709_vm2, %v1708_v60, 0.0 }
 0x504   : > { %4603 = vmatmul.mubr.msk.f32.gmra.mrb[42].mxu0 %vm600_vm0, %v2188_v47 }
 0x505   : > { %4605 = vmatprep.mubr.msk.f32.mxu0 %vm600_vm0, %v2214_v59  ;;  %v1681_v59 = vmul.f32 %v6139_v27, %v1642_v46  ;;  %v1725_v46 = vsel %vm1709_vm2, %v1682_v31, 0.0 }
 0x506   : > { %v2217_v15 = vpop.trf.xlu0  ;;  %v2246_v19 = vpop.trf.xlu1 }
 0x507   : > { %v1722_v30 = vsel %vm1709_vm2, %v1681_v59, 0.0 }
 0x508   : > { %4606 = vmatmul.mubr.msk.f32.gmra.mrb[44].mxu0 %vm600_vm0, %v2215_v24 }
 0x509   : > { %4608 = vmatprep.mubr.msk.f32.mxu0 %vm600_vm0, %v2216_v61 }
 0x50a   : > { %v2218_v33 = vpop.trf.xlu0  ;;  %v2247_v25 = vpop.trf.xlu1 }
 0x50c   : > { %4609 = vmatmul.mubr.msk.f32.gmra.mrb[46].mxu0 %vm600_vm0, %v2217_v15  ;;  %v1728_v15 = vsel %vm1709_vm2, %v1683_v44, 0.0  ;;  %v1749_v44 = vsel %vm1709_vm2, %v1690_v62, 0.0 }
 0x50d   : > { %4611 = vmatprep.mubr.msk.f32.mxu0 %vm600_vm0, %v2218_v33  ;;  %1711 = vadd.xlane.f32.xlu0 %v1710_v34  ;;  %v1716_v34 = vsel %vm1709_vm2, %v1679_v57, 0.0  ;;  %v1698_v57 = vmul.f32 %v6139_v27, %v6825_v22 }
 0x50e   : > { %v2219_v13 = vpop.trf.xlu0  ;;  %v2248_v24 = vpop.trf.xlu1 }
 0x510   : > { %4612 = vmatmul.mubr.msk.f32.gmra.mrb[48].mxu0 %vm600_vm0, %v2219_v13  ;;  %v1734_v13 = vsel %vm1709_vm2, %v1685_v38, 0.0  ;;  %v1699_v38 = vmul.f32 %v6139_v27, %v6827_v29 }
 0x511   : > { %1723 = vadd.xlane.f32.xlu0 %v1722_v30  ;;  %v1719_v30 = vsel %vm1709_vm2, %v1680_v56, 0.0  ;;  %v1702_v56 = vmul.f32 %v6139_v27, %v6829_v55  ;;  %v6347_v55 = vld [vmem:[#allocation13 + $0x30] sm:$0xff] }
 0x512   : > { %v2220_v17 = vpop.trf.xlu0  ;;  %v2249_v61 = vpop.trf.xlu1 }
 0x513   : > { %4614 = vmatprep.mubr.msk.f32.mxu0 %vm600_vm0, %v2220_v17  ;;  %v1740_v17 = vsel %vm1709_vm2, %v1687_v36, 0.0  ;;  %v6831_v36 = vmax.f32 %v6087_v35, 0.0  ;;  %v1706_v35 = vmul.f32 %v6139_v27, %v6832_v16 }
 0x514   : > { %4615 = vmatmul.mubr.msk.f32.gmra.mrb[50].mxu0 %vm600_vm0, %v2246_v19 }
 0x515   : > { %4617 = vmatprep.mubr.msk.f32.mxu0 %vm600_vm0, %v2247_v25  ;;  %1726 = vadd.xlane.f32.xlu0 %v1725_v46  ;;  %v1703_v3 = vmul.f32 %v6139_v27, %v6831_v36  ;;  %v1797_v8 = vsel %vm1709_vm2, %v1706_v35, 0.0 }
 0x516   : > { %v2278_v47 = vpop.trf.xlu0  ;;  %v2250_v42 = vpop.trf.xlu1 }
 0x517   : > { %v1788_v62 = vsel %vm1709_vm2, %v1703_v3, 0.0 }
 0x518   : > { %4618 = vmatmul.mubr.msk.f32.gmra.mrb[52].mxu0 %vm600_vm0, %v2248_v24 }
 0x519   : > { %4620 = vmatprep.mubr.msk.f32.mxu0 %vm600_vm0, %v2249_v61  ;;  %1729 = vadd.xlane.f32.xlu0 %v1728_v15  ;;  %v1695_v15 = vmul.f32 %v6139_v27, %v6823_v14 }
 0x51a   : > { %v2279_v52 = vpop.trf.xlu0  ;;  %v2251_v19 = vpop.trf.xlu1 }
 0x51c   : > { %4621 = vmatmul.mubr.msk.f32.gmra.mrb[54].mxu0 %vm600_vm0, %v2250_v42  ;;  %v1752_v42 = vsel %vm1709_vm2, %v1691_v2, 0.0  ;;  %v6311_v2 = vld [vmem:[#allocation13 + $0x8] sm:$0xff] }
 0x51d   : > { %4623 = vmatprep.mubr.msk.f32.mxu0 %vm600_vm0, %v2251_v19  ;;  %1738 = vadd.xlane.f32.xlu0 %v1737_v54  ;;  %v1761_v19 = vsel %vm1709_vm2, %v1694_v12, 0.0  ;;  %v1782_v54 = vsel %vm1709_vm2, %v1701_v23, 0.0 }
 0x51e   : > { %v2280_v28 = vpop.trf.xlu0  ;;  %v2252_v33 = vpop.trf.xlu1 }
 0x51f   : > { %1714 = vadd.xlane.f32.xlu1 %v1713_v32 }
 0x520   : > { %4624 = vmatmul.mubr.msk.f32.gmra.mrb[56].mxu0 %vm600_vm0, %v2252_v33  ;;  %v1764_v33 = vsel %vm1709_vm2, %v1695_v15, 0.0 }
 0x521   : > { %4626 = vmatprep.mubr.msk.f32.mxu0 %vm600_vm0, %v2278_v47  ;;  %1732 = vadd.xlane.f32.xlu0 %v1731_v51  ;;  %v1779_v51 = vsel %vm1709_vm2, %v1700_v53, 0.0 }
 0x522   : > { %v2281_v39 = vpop.trf.xlu0  ;;  %v2310_v25 = vpop.trf.xlu1 }
 0x523   : > { %1717 = vadd.xlane.f32.xlu1 %v1716_v34 }
 0x524   : > { %4627 = vmatmul.mubr.msk.f32.gmra.mrb[58].mxu0 %vm600_vm0, %v2279_v52 }
 0x525   : > { %4629 = vmatprep.mubr.msk.f32.mxu0 %vm600_vm0, %v2280_v28  ;;  %1747 = vadd.xlane.f32.xlu0 %v1746_v6  ;;  %v1794_v6 = vsel %vm1709_vm2, %v1705_v48, 0.0 }
 0x526   : > { %v2282_v58 = vpop.trf.xlu0  ;;  %v2311_v59 = vpop.trf.xlu1 }
 0x527   : > { %1735 = vadd.xlane.f32.xlu1 %v1734_v13 }
 0x528   : > { %4630 = vmatmul.mubr.msk.f32.gmra.mrb[60].mxu0 %vm600_vm0, %v2281_v39 }
 0x529   : > { %4632 = vmatprep.mubr.msk.f32.mxu0 %vm600_vm0, %v2282_v58  ;;  %1744 = vadd.xlane.f32.xlu0 %v1743_v63  ;;  %v1791_v63 = vsel %vm1709_vm2, %v1704_v4, 0.0 }
 0x52a   : > { %v2283_v41 = vpop.trf.xlu0  ;;  %v2312_v24 = vpop.trf.xlu1 }
 0x52b   : > { %1720 = vadd.xlane.f32.xlu1 %v1719_v30 }
 0x52c   : > { %4633 = vmatmul.mubr.msk.f32.gmra.mrb[62].mxu0 %vm600_vm0, %v2283_v41 }
 0x52d   : > { %1759 = vadd.xlane.f32.xlu0 %v1758_v18 }
 0x52e   : > { %v2284_v31 = vpop.trf.xlu0  ;;  %v2313_v0 = vpop.trf.xlu1 }
 0x52f   : > { %4635 = vmatprep.mubr.msk.f32.mxu0 %vm600_vm0, %v2284_v31  ;;  %1741 = vadd.xlane.f32.xlu1 %v1740_v17  ;;  %v6833_v31 = vmax.f32 %v6115_v1, 0.0 }
 0x530   : > { %4636 = vmatmul.mubr.msk.f32.gmra.mrb[64].mxu0 %vm600_vm0, %v2310_v25  ;;  %v1773_v25 = vsel %vm1709_vm2, %v1698_v57, 0.0 }
 0x531   : > { %4638 = vmatprep.mubr.msk.f32.mxu0 %vm600_vm0, %v2311_v59  ;;  %1756 = vadd.xlane.f32.xlu0 %v1755_v11  ;;  %v1776_v59 = vsel %vm1709_vm2, %v1699_v38, 0.0 }
 0x532   : > { %v2342_v5 = vpop.trf.xlu0  ;;  %v2314_v61 = vpop.trf.xlu1 }
 0x533   : > { %1750 = vadd.xlane.f32.xlu1 %v1749_v44 }
 0x534   : > { %4639 = vmatmul.mubr.msk.f32.gmra.mrb[66].mxu0 %vm600_vm0, %v2312_v24  ;;  %v1785_v24 = vsel %vm1709_vm2, %v1702_v56, 0.0 }
 0x535   : > { %4641 = vmatprep.mubr.msk.f32.mxu0 %vm600_vm0, %v2313_v0  ;;  %1771 = vadd.xlane.f32.xlu0 %v1770_v43  ;;  %v1707_v0 = vmul.f32 %v6139_v27, %v6833_v31 }
 0x536   : > { %v2343_v46 = vpop.trf.xlu0  ;;  %v2315_v47 = vpop.trf.xlu1 }
 0x537   : > { %1753 = vadd.xlane.f32.xlu1 %v1752_v42  ;;  %v1800_v11 = vsel %vm1709_vm2, %v1707_v0, 0.0  ;;  %v6323_v42 = vld [vmem:[#allocation13 + $0x18] sm:$0xff] }
 0x538   : > { %4642 = vmatmul.mubr.msk.f32.gmra.mrb[68].mxu0 %vm600_vm0, %v2314_v61 }
 0x539   : > { %4644 = vmatprep.mubr.msk.f32.mxu0 %vm600_vm0, %v2315_v47  ;;  %1768 = vadd.xlane.f32.xlu0 %v1767_v45  ;;  %v6328_v45 = vld [vmem:[#allocation13 + $0x10] sm:$0xff] }
 0x53a   : > { %v2344_v50 = vpop.trf.xlu0  ;;  %v2316_v52 = vpop.trf.xlu1 }
 0x53b   : > { %1762 = vadd.xlane.f32.xlu1 %v1761_v19 }
 0x53c   : > { %4645 = vmatmul.mubr.msk.f32.gmra.mrb[70].mxu0 %vm600_vm0, %v2316_v52 }
 0x53d   : > { %1783 = vadd.xlane.f32.xlu0 %v1782_v54  ;;  %4647 = vmatprep.mubr.msk.f32.mxu0 %vm600_vm0, %v2342_v5  ;;  %v6313_v5 = vld [vmem:[#allocation13] sm:$0xff] }
 0x53e   : > { %v2345_v28 = vpop.trf.xlu0  ;;  %v2374_v32 = vpop.trf.xlu1 }
 0x53f   : > { %1765 = vadd.xlane.f32.xlu1 %v1764_v33  ;;  %v6337_v33 = vld [vmem:[#allocation13 + $0x28] sm:$0xff] }
 0x540   : > { %4648 = vmatmul.mubr.msk.f32.gmra.mrb[72].mxu0 %vm600_vm0, %v2343_v46 }
 0x541   : > { %1780 = vadd.xlane.f32.xlu0 %v1779_v51  ;;  %4650 = vmatprep.mubr.msk.f32.mxu0 %vm600_vm0, %v2344_v50 }
 0x542   : > { %v2346_v39 = vpop.trf.xlu0  ;;  %v2375_v34 = vpop.trf.xlu1 }
 0x543   : > { %1774 = vadd.xlane.f32.xlu1 %v1773_v25 }
 0x544   : > { %4651 = vmatmul.mubr.msk.f32.gmra.mrb[74].mxu0 %vm600_vm0, %v2345_v28 }
 0x545   : > { %1795 = vadd.xlane.f32.xlu0 %v1794_v6  ;;  %4653 = vmatprep.mubr.msk.f32.mxu0 %vm600_vm0, %v2346_v39 }
 0x546   : > { %v2347_v58 = vpop.trf.xlu0  ;;  %v2376_v13 = vpop.trf.xlu1 }
 0x547   : > { %1777 = vadd.xlane.f32.xlu1 %v1776_v59 }
 0x548   : > { %4654 = vmatmul.mubr.msk.f32.gmra.mrb[76].mxu0 %vm600_vm0, %v2347_v58 }
 0x549   : > { %1792 = vadd.xlane.f32.xlu0 %v1791_v63 }
 0x54a   : > { %v2348_v41 = vpop.trf.xlu0  ;;  %v2377_v30 = vpop.trf.xlu1 }
 0x54b   : > { %4656 = vmatprep.mubr.msk.f32.mxu0 %vm600_vm0, %v2348_v41  ;;  %1786 = vadd.xlane.f32.xlu1 %v1785_v24 }
 0x54c   : > { %4657 = vmatmul.mubr.msk.f32.gmra.mrb[78].mxu0 %vm600_vm0, %v2374_v32  ;;  %v6339_v32 = vld [vmem:[#allocation13 + $0x20] sm:$0xff] }
 0x54d   : > { %1804 = vadd.xlane.f32.xlu0 %v1803_v26  ;;  %4659 = vmatprep.mubr.msk.f32.mxu0 %vm600_vm0, %v2375_v34 }
 0x54e   : > { %v2378_v18 = vpop.trf.xlu1 }
 0x54f   : > { %1789 = vadd.xlane.f32.xlu1 %v1788_v62 }
 0x550   : > { %4660 = vmatmul.mubr.msk.f32.gmra.mrb[80].mxu0 %vm600_vm0, %v2376_v13 }
 0x551   : > { %4662 = vmatprep.mubr.msk.f32.mxu0 %vm600_vm0, %v2377_v30 }
 0x552   : > { %v2379_v17 = vpop.trf.xlu1 }
 0x553   : > { %1798 = vadd.xlane.f32.xlu1 %v1797_v8 }
 0x554   : > { %4663 = vmatmul.mubr.msk.f32.gmra.mrb[82].mxu0 %vm600_vm0, %v2378_v18 }
 0x555   : > { %4665 = vmatprep.mubr.msk.f32.mxu0 %vm600_vm0, %v2379_v17 }
 0x556   : > { %v2380_v7 = vpop.trf.xlu1 }
 0x557   : > { %1801 = vadd.xlane.f32.xlu1 %v1800_v11 }
 0x558   : > { %4666 = vmatmul.mubr.msk.f32.gmra.mrb[84].mxu0 %vm600_vm0, %v2380_v7 }
 0x569   : > { %v6319_v12 = vpop.permute.xlu0 %2979 }
 0x56a   : > { %v6315_v27 = vpop.permute.xlu1 %2984 }
 0x56d   : > { %v6349_v56 = vpop.permute.xlu0 %3004 }
 0x56e   : > { %v6325_v20 = vpop.permute.xlu1 %2989 }
 0x572   : > { %v6333_v22 = vpop.permute.xlu1 %2994 }
 0x576   : > { %v6345_v4 = vpop.permute.xlu1 %2999 }
 0x57a   : > { %v6356_v26 = vpop.permute.xlu1 %3009 }
 0x5b6   : > { %v4586_v1 = vpop.f32.mrb[30].mxu0 }
 0x5b7   : > { %v2641_v61 = vadd.f32 %v4586_v1, %v6311_v2  ;;  %v2635_v44 = vpop.f32.mrb[31].mxu0 }
 0x5b8   : > { %v2636_v37 = vadd.f32 %v2635_v44, %v6313_v5 }
 0x5b9   : > { %v2915_v43 = vmax.f32 %v2641_v61, 0.0 }
 0x5ba   : > { %v2914_v10 = vmax.f32 %v2636_v37, 0.0 }
 0x5bb   : > { %v3013_v46 = vmul.f32 %v6315_v27, %v2915_v43 }
 0x5bc   : > { %v3012_v47 = vmul.f32 %v6319_v12, %v2914_v10 }
 0x5bd   : > { %v3069_v23 = vsel %vm600_vm0, %v3013_v46, 0.0 }
 0x5be   : > { %v3068_v14 = vsel %vm600_vm0, %v3012_v47, 0.0  ;;  %v4589_v15 = vpop.f32.mrb[32].mxu0 }
 0x5bf   : > { %v3070_v50 = vadd.f32 %v3069_v23, %v3068_v14  ;;  %v2651_v52 = vadd.f32 %v4589_v15, %v6323_v42  ;;  %v2645_v19 = vpop.f32.mrb[33].mxu0 }
 0x5c0   : > { %v2646_v9 = vadd.f32 %v2645_v19, %v6328_v45 }
 0x5c1   : > { %v2917_v53 = vmax.f32 %v2651_v52, 0.0 }
 0x5c2   : > { %v2916_v54 = vmax.f32 %v2646_v9, 0.0 }
 0x5c3   : > { %v3015_v57 = vmul.f32 %v6333_v22, %v2917_v53 }
 0x5c4   : > { %v3014_v28 = vmul.f32 %v6325_v20, %v2916_v54 }
 0x5c5   : > { %v3073_v39 = vsel %vm600_vm0, %v3015_v57, 0.0 }
 0x5c6   : > { %v3071_v49 = vsel %vm600_vm0, %v3014_v28, 0.0  ;;  %v4592_v48 = vpop.f32.mrb[34].mxu0 }
 0x5c7   : > { %v3072_v51 = vadd.f32 %v3071_v49, %v3070_v50  ;;  %v2661_v29 = vadd.f32 %v4592_v48, %v6337_v33  ;;  %v2655_v38 = vpop.f32.mrb[35].mxu0 }
 0x5c8   : > { %v2656_v25 = vadd.f32 %v2655_v38, %v6339_v32 }
 0x5c9   : > { %v2919_v34 = vmax.f32 %v2661_v29, 0.0  ;;  %v3074_v40 = vadd.f32 %v3073_v39, %v3072_v51 }
 0x5ca   : > { %v2918_v6 = vmax.f32 %v2656_v25, 0.0 }
 0x5cb   : > { %v4595_v58 = vpop.f32.mrb[36].mxu0  ;;  %v3017_v59 = vmul.f32 %v6349_v56, %v2919_v34 }
 0x5cc   : > { %v3016_v13 = vmul.f32 %v6345_v4, %v2918_v6  ;;  %v2671_v21 = vadd.f32 %v4595_v58, %v6313_v5  ;;  %v2665_v60 = vpop.f32.mrb[37].mxu0 }
 0x5cd   : > { %v2666_v63 = vadd.f32 %v2665_v60, %v6347_v55  ;;  %v3077_v16 = vsel %vm600_vm0, %v3017_v59, 0.0 }
 0x5ce   : > { %v3075_v36 = vsel %vm600_vm0, %v3016_v13, 0.0  ;;  %v2921_v41 = vmax.f32 %v2671_v21, 0.0 }
 0x5cf   : > { %v3076_v3 = vadd.f32 %v3075_v36, %v3074_v40  ;;  %v2920_v24 = vmax.f32 %v2666_v63, 0.0  ;;  %v4598_v30 = vpop.f32.mrb[38].mxu0 }
 0x5d0   : > { %v2681_v35 = vadd.f32 %v4598_v30, %v6328_v45  ;;  %v2675_v18 = vpop.f32.mrb[39].mxu0  ;;  %v3019_v8 = vmul.f32 %v6319_v12, %v2921_v41 }
 0x5d1   : > { %v3018_v62 = vmul.f32 %v6356_v26, %v2920_v24  ;;  %v3078_v31 = vadd.f32 %v3077_v16, %v3076_v3  ;;  %v2676_v0 = vadd.f32 %v2675_v18, %v6311_v2 }
 0x5d2   : > { %v2923_v17 = vmax.f32 %v2681_v35, 0.0  ;;  %v3087_v14 = vsel %vm600_vm0, %v3019_v8, 0.0 }
 0x5d3   : > { %v3079_v7 = vsel %vm600_vm0, %v3018_v62, 0.0  ;;  %v2922_v11 = vmax.f32 %v2676_v0, 0.0  ;;  %v4601_v1 = vpop.f32.mrb[40].mxu0 }
 0x5d4   : > { %v3080_v61 = vadd.f32 %v3079_v7, %v3078_v31  ;;  %v2691_v44 = vadd.f32 %v4601_v1, %v6339_v32  ;;  %v2685_v37 = vpop.f32.mrb[41].mxu0  ;;  %v3021_v43 = vmul.f32 %v6325_v20, %v2923_v17 }
 0x5d5   : > { %v3020_v10 = vmul.f32 %v6315_v27, %v2922_v11  ;;  %v2686_v46 = vadd.f32 %v2685_v37, %v6323_v42 }
 0x5d6   : > { %v3081_v47 = vrot.slane %v3080_v61, 4  ;;  %v2925_v23 = vmax.f32 %v2691_v44, 0.0  ;;  %v3090_v57 = vsel %vm600_vm0, %v3021_v43, 0.0 }
 0x5d7   : > { %v3088_v15 = vsel %vm600_vm0, %v3020_v10, 0.0  ;;  %v2924_v50 = vmax.f32 %v2686_v46, 0.0  ;;  %v4604_v52 = vpop.f32.mrb[42].mxu0 }
 0x5d8   : > { %v3082_v19 = vadd.f32 %v3081_v47, %v3080_v61  ;;  %v3089_v9 = vadd.f32 %v3088_v15, %v3087_v14  ;;  %v2701_v53 = vadd.f32 %v4604_v52, %v6347_v55  ;;  %v2695_v54 = vpop.f32.mrb[43].mxu0  ;;  %v3023_v28 = vmul.f32 %v6345_v4, %v2925_v23 }
 0x5d9   : > { %v3022_v49 = vmul.f32 %v6333_v22, %v2924_v50  ;;  %v2696_v48 = vadd.f32 %v2695_v54, %v6337_v33 }
 0x5da   : > { %v3083_v51 = vrot.slane %v3082_v19, 2  ;;  %v3091_v29 = vadd.f32 %v3090_v57, %v3089_v9  ;;  %v2927_v38 = vmax.f32 %v2701_v53, 0.0  ;;  %v3094_v13 = vsel %vm600_vm0, %v3023_v28, 0.0 }
 0x5db   : > { %v3092_v39 = vsel %vm600_vm0, %v3022_v49, 0.0  ;;  %v2926_v25 = vmax.f32 %v2696_v48, 0.0  ;;  %v4607_v34 = vpop.f32.mrb[44].mxu0 }
 0x5dc   : > { %v3093_v40 = vadd.f32 %v3092_v39, %v3091_v29  ;;  %v2711_v6 = vadd.f32 %v4607_v34, %v6311_v2  ;;  %v2705_v58 = vpop.f32.mrb[45].mxu0  ;;  %v3084_v59 = vadd.f32 %v3083_v51, %v3082_v19  ;;  %v3025_v21 = vmul.f32 %v6356_v26, %v2927_v38 }
 0x5dd   : > { %v3024_v60 = vmul.f32 %v6349_v56, %v2926_v25  ;;  %v2706_v63 = vadd.f32 %v2705_v58, %v6313_v5 }
 0x5de   : > { %v3095_v36 = vadd.f32 %v3094_v13, %v3093_v40  ;;  %v2929_v3 = vmax.f32 %v2711_v6, 0.0  ;;  %v3085_v41 = vrot.slane %v3084_v59, 1  ;;  %v3098_v17 = vsel %vm600_vm0, %v3025_v21, 0.0 }
 0x5df   : > { %v3096_v24 = vsel %vm600_vm0, %v3024_v60, 0.0  ;;  %v2928_v30 = vmax.f32 %v2706_v63, 0.0  ;;  %v4610_v16 = vpop.f32.mrb[46].mxu0 }
 0x5e0   : > { %v3097_v35 = vadd.f32 %v3096_v24, %v3095_v36  ;;  %v3027_v18 = vmul.f32 %v6315_v27, %v2929_v3  ;;  %v2721_v62 = vadd.f32 %v4610_v16, %v6323_v42  ;;  %v2715_v31 = vpop.f32.mrb[47].mxu0  ;;  %v3086_v0 = vadd.f32 %v3085_v41, %v3084_v59 }
 0x5e1   : > { %v3026_v8 = vmul.f32 %v6319_v12, %v2928_v30  ;;  %v2716_v7 = vadd.f32 %v2715_v31, %v6328_v45 }
 0x5e2   : > { %v3099_v11 = vadd.f32 %v3098_v17, %v3097_v35  ;;  %v3107_v1 = vsel %vm600_vm0, %v3027_v18, 0.0  ;;  %v2931_v61 = vmax.f32 %v2721_v62, 0.0  ;;  %3233 = vbcast.lane.b32.xlu0 %v3086_v0, 264  ;;  %3229 = vbcast.lane.b32.xlu1 %v3086_v0, 256  ;;  %v6404_v35 = vpop.xlane.xlu0 %1711 }
 0x5e3   : > { %v3106_v44 = vsel %vm600_vm0, %v3026_v8, 0.0  ;;  %v2930_v37 = vmax.f32 %v2716_v7, 0.0  ;;  %v4613_v43 = vpop.f32.mrb[48].mxu0 }
 0x5e4   : > { %v3100_v10 = vrot.slane %v3099_v11, 4  ;;  %v3108_v46 = vadd.f32 %v3107_v1, %v3106_v44  ;;  %v2731_v47 = vadd.f32 %v4613_v43, %v6337_v33  ;;  %v2725_v23 = vpop.f32.mrb[49].mxu0  ;;  %v3029_v14 = vmul.f32 %v6333_v22, %v2931_v61 }
 0x5e5   : > { %v3028_v15 = vmul.f32 %v6325_v20, %v2930_v37  ;;  %v2726_v50 = vadd.f32 %v2725_v23, %v6339_v32 }
 0x5e6   : > { %v3101_v52 = vadd.f32 %v3100_v10, %v3099_v11  ;;  %v2933_v19 = vmax.f32 %v2731_v47, 0.0  ;;  %3237 = vbcast.lane.b32.xlu0 %v3086_v0, 272  ;;  %v3111_v51 = vsel %vm600_vm0, %v3029_v14, 0.0 }
 0x5e7   : > { %v3109_v9 = vsel %vm600_vm0, %v3028_v15, 0.0  ;;  %v2932_v53 = vmax.f32 %v2726_v50, 0.0  ;;  %v4616_v54 = vpop.f32.mrb[50].mxu0 }
 0x5e8   : > { %v3110_v57 = vadd.f32 %v3109_v9, %v3108_v46  ;;  %v2741_v28 = vadd.f32 %v4616_v54, %v6313_v5  ;;  %v2735_v49 = vpop.f32.mrb[51].mxu0  ;;  %v3102_v48 = vrot.slane %v3101_v52, 2  ;;  %v3031_v29 = vmul.f32 %v6349_v56, %v2933_v19 }
 0x5e9   : > { %v3030_v38 = vmul.f32 %v6345_v4, %v2932_v53  ;;  %v2736_v39 = vadd.f32 %v2735_v49, %v6347_v55 }
 0x5ea   : > { %v3112_v25 = vadd.f32 %v3111_v51, %v3110_v57  ;;  %3241 = vbcast.lane.b32.xlu0 %v3086_v0, 280  ;;  %v3103_v34 = vadd.f32 %v3102_v48, %v3101_v52  ;;  %v2935_v6 = vmax.f32 %v2741_v28, 0.0  ;;  %v3115_v36 = vsel %vm600_vm0, %v3031_v29, 0.0  ;;  %v6415_v52 = vpop.xlane.xlu0 %1723 }
 0x5eb   : > { %v3113_v40 = vsel %vm600_vm0, %v3030_v38, 0.0  ;;  %v2934_v58 = vmax.f32 %v2736_v39, 0.0  ;;  %v4619_v59 = vpop.f32.mrb[52].mxu0 }
 0x5ec   : > { %v3114_v13 = vadd.f32 %v3113_v40, %v3112_v25  ;;  %v2751_v21 = vadd.f32 %v4619_v59, %v6328_v45  ;;  %v2745_v60 = vpop.f32.mrb[53].mxu0  ;;  %v3104_v63 = vrot.slane %v3103_v34, 1  ;;  %v3033_v18 = vmul.f32 %v6319_v12, %v2935_v6 }
 0x5ed   : > { %v3032_v3 = vmul.f32 %v6356_v26, %v2934_v58  ;;  %v2746_v41 = vadd.f32 %v2745_v60, %v6311_v2 }
 0x5ee   : > { %v3116_v24 = vadd.f32 %v3115_v36, %v3114_v13  ;;  %v2937_v30 = vmax.f32 %v2751_v21, 0.0  ;;  %v3105_v16 = vadd.f32 %v3104_v63, %v3103_v34  ;;  %v3125_v43 = vsel %vm600_vm0, %v3033_v18, 0.0  ;;  %v6427_v63 = vpop.xlane.xlu0 %1726 }
 0x5ef   : > { %v3117_v62 = vsel %vm600_vm0, %v3032_v3, 0.0  ;;  %v2936_v31 = vmax.f32 %v2746_v41, 0.0  ;;  %v4622_v0 = vpop.f32.mrb[54].mxu0 }
 0x5f0   : > { %v3118_v17 = vadd.f32 %v3117_v62, %v3116_v24  ;;  %v2761_v8 = vadd.f32 %v4622_v0, %v6339_v32  ;;  %v2755_v7 = vpop.f32.mrb[55].mxu0  ;;  %3244 = vbcast.lane.b32.xlu1 %v3105_v16, 256  ;;  %v3035_v11 = vmul.f32 %v6325_v20, %v2937_v30  ;;  %v6430_v24 = vpop.xlane.xlu1 %1714 }
 0x5f1   : > { %v3034_v1 = vmul.f32 %v6315_v27, %v2936_v31  ;;  %v2756_v61 = vadd.f32 %v2755_v7, %v6323_v42 }
 0x5f2   : > { %v3119_v44 = vrot.slane %v3118_v17, 4  ;;  %v2939_v37 = vmax.f32 %v2761_v8, 0.0  ;;  %v3128_v19 = vsel %vm600_vm0, %v3035_v11, 0.0 }
 0x5f3   : > { %v3126_v10 = vsel %vm600_vm0, %v3034_v1, 0.0  ;;  %v2938_v46 = vmax.f32 %v2756_v61, 0.0  ;;  %v4625_v47 = vpop.f32.mrb[56].mxu0 }
 0x5f4   : > { %v3120_v23 = vadd.f32 %v3119_v44, %v3118_v17  ;;  %v3127_v14 = vadd.f32 %v3126_v10, %v3125_v43  ;;  %v2771_v15 = vadd.f32 %v4625_v47, %v6347_v55  ;;  %v2765_v50 = vpop.f32.mrb[57].mxu0  ;;  %3248 = vbcast.lane.b32.xlu1 %v3105_v16, 264  ;;  %v3037_v9 = vmul.f32 %v6345_v4, %v2939_v37 }
 0x5f5   : > { %v3036_v53 = vmul.f32 %v6333_v22, %v2938_v46  ;;  %v2766_v54 = vadd.f32 %v2765_v50, %v6337_v33 }
 0x5f6   : > { %v3121_v57 = vrot.slane %v3120_v23, 2  ;;  %v3129_v28 = vadd.f32 %v3128_v19, %v3127_v14  ;;  %v2941_v49 = vmax.f32 %v2771_v15, 0.0  ;;  %v3132_v40 = vsel %vm600_vm0, %v3037_v9, 0.0  ;;  %v6445_v19 = vpop.xlane.xlu1 %1717 }
 0x5f7   : > { %v3130_v48 = vsel %vm600_vm0, %v3036_v53, 0.0  ;;  %v2940_v51 = vmax.f32 %v2766_v54, 0.0  ;;  %v4628_v29 = vpop.f32.mrb[58].mxu0 }
 0x5f8   : > { %v3131_v38 = vadd.f32 %v3130_v48, %v3129_v28  ;;  %v2781_v39 = vadd.f32 %v4628_v29, %v6311_v2  ;;  %v2775_v25 = vpop.f32.mrb[59].mxu0  ;;  %3252 = vbcast.lane.b32.xlu1 %v3105_v16, 272  ;;  %v3122_v34 = vadd.f32 %v3121_v57, %v3120_v23  ;;  %v3039_v6 = vmul.f32 %v6356_v26, %v2941_v49  ;;  %v6440_v23 = vpop.xlane.xlu0 %1729 }
 0x5f9   : > { %v3038_v58 = vmul.f32 %v6349_v56, %v2940_v51  ;;  %v2776_v59 = vadd.f32 %v2775_v25, %v6313_v5 }
 0x5fa   : > { %v3133_v13 = vadd.f32 %v3132_v40, %v3131_v38  ;;  %v2943_v21 = vmax.f32 %v2781_v39, 0.0  ;;  %v3123_v60 = vrot.slane %v3122_v34, 1  ;;  %v3136_v17 = vsel %vm600_vm0, %v3039_v6, 0.0 }
 0x5fb   : > { %v3134_v36 = vsel %vm600_vm0, %v3038_v58, 0.0  ;;  %v2942_v3 = vmax.f32 %v2776_v59, 0.0  ;;  %v4631_v41 = vpop.f32.mrb[60].mxu0 }
 0x5fc   : > { %v3135_v30 = vadd.f32 %v3134_v36, %v3133_v13  ;;  %v3041_v18 = vmul.f32 %v6315_v27, %v2943_v21  ;;  %v2791_v62 = vadd.f32 %v4631_v41, %v6323_v42  ;;  %v2785_v31 = vpop.f32.mrb[61].mxu0  ;;  %3256 = vbcast.lane.b32.xlu1 %v3105_v16, 280  ;;  %v3124_v0 = vadd.f32 %v3123_v60, %v3122_v34  ;;  %v6453_v58 = vpop.xlane.xlu0 %1738 }
 0x5fd   : > { %v3040_v8 = vmul.f32 %v6319_v12, %v2942_v3  ;;  %v2786_v7 = vadd.f32 %v2785_v31, %v6328_v45  ;;  %v6456_v36 = vpop.xlane.xlu1 %1735 }
 0x5fe   : > { %v3137_v11 = vadd.f32 %v3136_v17, %v3135_v30  ;;  %v3145_v1 = vsel %vm600_vm0, %v3041_v18, 0.0  ;;  %v2945_v61 = vmax.f32 %v2791_v62, 0.0  ;;  %3259 = vbcast.lane.b32.xlu0 %v3124_v0, 256 }
 0x5ff   : > { %v3144_v44 = vsel %vm600_vm0, %v3040_v8, 0.0  ;;  %v2944_v37 = vmax.f32 %v2786_v7, 0.0  ;;  %v4634_v43 = vpop.f32.mrb[62].mxu0 }
 0x600   : > { %v3138_v10 = vrot.slane %v3137_v11, 4  ;;  %v3146_v46 = vadd.f32 %v3145_v1, %v3144_v44  ;;  %v2801_v16 = vadd.f32 %v4634_v43, %v6337_v33  ;;  %v2795_v47 = vpop.f32.mrb[63].mxu0  ;;  %3263 = vbcast.lane.b32.xlu1 %v3124_v0, 264  ;;  %v3043_v14 = vmul.f32 %v6333_v22, %v2945_v61 }
 0x601   : > { %v3042_v15 = vmul.f32 %v6325_v20, %v2944_v37  ;;  %v2796_v50 = vadd.f32 %v2795_v47, %v6339_v32 }
 0x602   : > { %v3139_v9 = vadd.f32 %v3138_v10, %v3137_v11  ;;  %v2947_v53 = vmax.f32 %v2801_v16, 0.0  ;;  %3267 = vbcast.lane.b32.xlu0 %v3124_v0, 272  ;;  %v3149_v38 = vsel %vm600_vm0, %v3043_v14, 0.0 }
 0x603   : > { %v3147_v54 = vsel %vm600_vm0, %v3042_v15, 0.0  ;;  %v2946_v57 = vmax.f32 %v2796_v50, 0.0  ;;  %v4637_v28 = vpop.f32.mrb[64].mxu0  ;;  %v6470_v15 = vpop.xlane.xlu1 %1720 }
 0x604   : > { %v3148_v49 = vadd.f32 %v3147_v54, %v3146_v46  ;;  %v2811_v48 = vadd.f32 %v4637_v28, %v6313_v5  ;;  %v2805_v51 = vpop.f32.mrb[65].mxu0  ;;  %3271 = vbcast.lane.b32.xlu1 %v3124_v0, 280  ;;  %v3140_v29 = vrot.slane %v3139_v9, 2  ;;  %v3045_v39 = vmul.f32 %v6349_v56, %v2947_v53  ;;  %v6465_v46 = vpop.xlane.xlu0 %1732 }
 0x605   : > { %v3044_v25 = vmul.f32 %v6345_v4, %v2946_v57  ;;  %v2806_v34 = vadd.f32 %v2805_v51, %v6347_v55 }
 0x606   : > { %v3150_v40 = vadd.f32 %v3149_v38, %v3148_v49  ;;  %v3141_v6 = vadd.f32 %v3140_v29, %v3139_v9  ;;  %v2949_v13 = vmax.f32 %v2811_v48, 0.0  ;;  %v3153_v62 = vsel %vm600_vm0, %v3045_v39, 0.0 }
 0x607   : > { %v3151_v59 = vsel %vm600_vm0, %v3044_v25, 0.0  ;;  %v2948_v21 = vmax.f32 %v2806_v34, 0.0  ;;  %v4640_v60 = vpop.f32.mrb[66].mxu0 }
 0x608   : > { %v3152_v3 = vadd.f32 %v3151_v59, %v3150_v40  ;;  %v2821_v41 = vadd.f32 %v4640_v60, %v6328_v45  ;;  %v2815_v30 = vpop.f32.mrb[67].mxu0  ;;  %v3142_v18 = vrot.slane %v3141_v6, 1  ;;  %v3047_v11 = vmul.f32 %v6319_v12, %v2949_v13  ;;  %v6479_v13 = vpop.xlane.xlu0 %1747 }
 0x609   : > { %v3046_v31 = vmul.f32 %v6356_v26, %v2948_v21  ;;  %v2816_v0 = vadd.f32 %v2815_v30, %v6311_v2 }
 0x60a   : > { %v3154_v17 = vadd.f32 %v3153_v62, %v3152_v3  ;;  %v2951_v8 = vmax.f32 %v2821_v41, 0.0  ;;  %v3143_v7 = vadd.f32 %v3142_v18, %v3141_v6  ;;  %v3163_v53 = vsel %vm600_vm0, %v3047_v11, 0.0  ;;  %v6482_v41 = vpop.xlane.xlu1 %1741 }
 0x60b   : > { %v3155_v1 = vsel %vm600_vm0, %v3046_v31, 0.0  ;;  %v2950_v61 = vmax.f32 %v2816_v0, 0.0  ;;  %v4643_v44 = vpop.f32.mrb[68].mxu0 }
 0x60c   : > { %v3156_v37 = vadd.f32 %v3155_v1, %v3154_v17  ;;  %v2831_v43 = vadd.f32 %v4643_v44, %v6339_v32  ;;  %v2825_v10 = vpop.f32.mrb[69].mxu0  ;;  %3278 = vbcast.lane.b32.xlu0 %v3143_v7, 264  ;;  %3274 = vbcast.lane.b32.xlu1 %v3143_v7, 256  ;;  %v3049_v16 = vmul.f32 %v6325_v20, %v2951_v8 }
 0x60d   : > { %v3048_v47 = vmul.f32 %v6315_v27, %v2950_v61  ;;  %v2826_v14 = vadd.f32 %v2825_v10, %v6323_v42 }
 0x60e   : > { %v3157_v50 = vrot.slane %v3156_v37, 4  ;;  %v2953_v9 = vmax.f32 %v2831_v43, 0.0  ;;  %v3166_v38 = vsel %vm600_vm0, %v3049_v16, 0.0 }
 0x60f   : > { %v3164_v54 = vsel %vm600_vm0, %v3048_v47, 0.0  ;;  %v2952_v57 = vmax.f32 %v2826_v14, 0.0  ;;  %v4646_v28 = vpop.f32.mrb[70].mxu0 }
 0x610   : > { %v3158_v49 = vadd.f32 %v3157_v50, %v3156_v37  ;;  %v3165_v48 = vadd.f32 %v3164_v54, %v3163_v53  ;;  %v2841_v51 = vadd.f32 %v4646_v28, %v6347_v55  ;;  %v2835_v29 = vpop.f32.mrb[71].mxu0  ;;  %3282 = vbcast.lane.b32.xlu0 %v3143_v7, 272  ;;  %v3051_v39 = vmul.f32 %v6345_v4, %v2953_v9  ;;  %v6492_v9 = vpop.xlane.xlu0 %1744 }
 0x611   : > { %v3050_v25 = vmul.f32 %v6333_v22, %v2952_v57  ;;  %v2836_v34 = vadd.f32 %v2835_v29, %v6337_v33  ;;  %3286 = vbcast.lane.b32.xlu1 %v3143_v7, 280  ;;  %v6497_v28 = vpop.xlane.xlu1 %1750 }
 0x612   : > { %v3159_v40 = vrot.slane %v3158_v49, 2  ;;  %v3167_v6 = vadd.f32 %v3166_v38, %v3165_v48  ;;  %v2955_v59 = vmax.f32 %v2841_v51, 0.0  ;;  %v3170_v0 = vsel %vm600_vm0, %v3051_v39, 0.0 }
 0x613   : > { %v3168_v21 = vsel %vm600_vm0, %v3050_v25, 0.0  ;;  %v2954_v60 = vmax.f32 %v2836_v34, 0.0  ;;  %v4649_v3 = vpop.f32.mrb[72].mxu0 }
 0x614   : > { %v3169_v30 = vadd.f32 %v3168_v21, %v3167_v6  ;;  %v2851_v18 = vadd.f32 %v4649_v3, %v6311_v2  ;;  %v2845_v62 = vpop.f32.mrb[73].mxu0  ;;  %v3160_v31 = vadd.f32 %v3159_v40, %v3158_v49  ;;  %v3053_v17 = vmul.f32 %v6356_v26, %v2955_v59 }
 0x615   : > { %v3052_v8 = vmul.f32 %v6349_v56, %v2954_v60  ;;  %v2846_v7 = vadd.f32 %v2845_v62, %v6313_v5 }
 0x616   : > { %v3171_v11 = vadd.f32 %v3170_v0, %v3169_v30  ;;  %v2957_v1 = vmax.f32 %v2851_v18, 0.0  ;;  %v3161_v61 = vrot.slane %v3160_v31, 1  ;;  %v3174_v53 = vsel %vm600_vm0, %v3053_v17, 0.0  ;;  %v6505_v18 = vpop.xlane.xlu0 %1759  ;;  %v6508_v17 = vpop.xlane.xlu1 %1753 }
 0x617   : > { %v3172_v44 = vsel %vm600_vm0, %v3052_v8, 0.0  ;;  %v2956_v37 = vmax.f32 %v2846_v7, 0.0  ;;  %v4652_v43 = vpop.f32.mrb[74].mxu0 }
 0x618   : > { %v3173_v10 = vadd.f32 %v3172_v44, %v3171_v11  ;;  %v3055_v16 = vmul.f32 %v6315_v27, %v2957_v1  ;;  %v2861_v47 = vadd.f32 %v4652_v43, %v6323_v42  ;;  %v2855_v14 = vpop.f32.mrb[75].mxu0  ;;  %v3162_v50 = vadd.f32 %v3161_v61, %v3160_v31 }
 0x619   : > { %v3054_v54 = vmul.f32 %v6319_v12, %v2956_v37  ;;  %v2856_v57 = vadd.f32 %v2855_v14, %v6328_v45 }
 0x61a   : > { %v3175_v49 = vadd.f32 %v3174_v53, %v3173_v10  ;;  %v3183_v48 = vsel %vm600_vm0, %v3055_v16, 0.0  ;;  %v2959_v51 = vmax.f32 %v2861_v47, 0.0  ;;  %3293 = vbcast.lane.b32.xlu0 %v3162_v50, 264  ;;  %3289 = vbcast.lane.b32.xlu1 %v3162_v50, 256 }
 0x61b   : > { %v3182_v29 = vsel %vm600_vm0, %v3054_v54, 0.0  ;;  %v2958_v38 = vmax.f32 %v2856_v57, 0.0  ;;  %v4655_v39 = vpop.f32.mrb[76].mxu0 }
 0x61c   : > { %v3176_v25 = vrot.slane %v3175_v49, 4  ;;  %v3184_v34 = vadd.f32 %v3183_v48, %v3182_v29  ;;  %v2871_v40 = vadd.f32 %v4655_v39, %v6337_v33  ;;  %v2865_v6 = vpop.f32.mrb[77].mxu0  ;;  %v3057_v59 = vmul.f32 %v6333_v22, %v2959_v51  ;;  %v6517_v48 = vpop.xlane.xlu0 %1756 }
 0x61d   : > { %v3056_v21 = vmul.f32 %v6325_v20, %v2958_v38  ;;  %v2866_v60 = vadd.f32 %v2865_v6, %v6339_v32  ;;  %v6522_v39 = vpop.xlane.xlu1 %1762 }
 0x61e   : > { %v3177_v3 = vadd.f32 %v3176_v25, %v3175_v49  ;;  %v2961_v30 = vmax.f32 %v2871_v40, 0.0  ;;  %3297 = vbcast.lane.b32.xlu0 %v3162_v50, 272  ;;  %3301 = vbcast.lane.b32.xlu1 %v3162_v50, 280  ;;  %v3187_v61 = vsel %vm600_vm0, %v3057_v59, 0.0 }
 0x61f   : > { %v3185_v62 = vsel %vm600_vm0, %v3056_v21, 0.0  ;;  %v2960_v31 = vmax.f32 %v2866_v60, 0.0  ;;  %v4658_v0 = vpop.f32.mrb[78].mxu0 }
 0x620   : > { %v3186_v8 = vadd.f32 %v3185_v62, %v3184_v34  ;;  %v2881_v7 = vadd.f32 %v4658_v0, %v6313_v5  ;;  %v2875_v11 = vpop.f32.mrb[79].mxu0  ;;  %v3178_v1 = vrot.slane %v3177_v3, 2  ;;  %v3059_v44 = vmul.f32 %v6349_v56, %v2961_v30 }
 0x621   : > { %v3058_v37 = vmul.f32 %v6345_v4, %v2960_v31  ;;  %v2876_v43 = vadd.f32 %v2875_v11, %v6347_v55 }
 0x622   : > { %v3188_v10 = vadd.f32 %v3187_v61, %v3186_v8  ;;  %v3179_v16 = vadd.f32 %v3178_v1, %v3177_v3  ;;  %v2963_v14 = vmax.f32 %v2881_v7, 0.0  ;;  %v3191_v51 = vsel %vm600_vm0, %v3059_v44, 0.0  ;;  %v6530_v7 = vpop.xlane.xlu0 %1771 }
 0x623   : > { %v3189_v47 = vsel %vm600_vm0, %v3058_v37, 0.0  ;;  %v2962_v50 = vmax.f32 %v2876_v43, 0.0  ;;  %v4661_v53 = vpop.f32.mrb[80].mxu0 }
 0x624   : > { %v3190_v54 = vadd.f32 %v3189_v47, %v3188_v10  ;;  %v2891_v5 = vadd.f32 %v4661_v53, %v6328_v45  ;;  %v2885_v57 = vpop.f32.mrb[81].mxu0  ;;  %v3180_v49 = vrot.slane %v3179_v16, 1  ;;  %v3061_v6 = vmul.f32 %v6319_v12, %v2963_v14 }
 0x625   : > { %v3060_v29 = vmul.f32 %v6356_v26, %v2962_v50  ;;  %v2886_v38 = vadd.f32 %v2885_v57, %v6311_v2 }
 0x626   : > { %v3192_v25 = vadd.f32 %v3191_v51, %v3190_v54  ;;  %v2965_v34 = vmax.f32 %v2891_v5, 0.0  ;;  %v3181_v40 = vadd.f32 %v3180_v49, %v3179_v16  ;;  %v3201_v12 = vsel %vm600_vm0, %v3061_v6, 0.0 }
 0x627   : > { %v3193_v59 = vsel %vm600_vm0, %v3060_v29, 0.0  ;;  %v2964_v45 = vmax.f32 %v2886_v38, 0.0  ;;  %v4664_v21 = vpop.f32.mrb[82].mxu0 }
 0x628   : > { %v3194_v60 = vadd.f32 %v3193_v59, %v3192_v25  ;;  %v2901_v3 = vadd.f32 %v4664_v21, %v6339_v32  ;;  %v2895_v30 = vpop.f32.mrb[83].mxu0  ;;  %3308 = vbcast.lane.b32.xlu0 %v3181_v40, 264  ;;  %3304 = vbcast.lane.b32.xlu1 %v3181_v40, 256  ;;  %v3063_v62 = vmul.f32 %v6325_v20, %v2965_v34  ;;  %v6534_v32 = vpop.xlane.xlu1 %1765 }
 0x629   : > { %v3062_v2 = vmul.f32 %v6315_v27, %v2964_v45  ;;  %v2896_v31 = vadd.f32 %v2895_v30, %v6323_v42 }
 0x62a   : > { %v3195_v0 = vrot.slane %v3194_v60, 4  ;;  %v2967_v8 = vmax.f32 %v2901_v3, 0.0  ;;  %v3204_v27 = vsel %vm600_vm0, %v3063_v62, 0.0 }
 0x62b   : > { %v3202_v11 = vsel %vm600_vm0, %v3062_v2, 0.0  ;;  %v2966_v1 = vmax.f32 %v2896_v31, 0.0  ;;  %v4667_v61 = vpop.f32.mrb[84].mxu0 }
 0x62c   : > { %v3196_v44 = vadd.f32 %v3195_v0, %v3194_v60  ;;  %v3203_v37 = vadd.f32 %v3202_v11, %v3201_v12  ;;  %v2911_v20 = vadd.f32 %v4667_v61, %v6347_v55  ;;  %v2905_v43 = vpop.f32.mrb[85].mxu0  ;;  %3312 = vbcast.lane.b32.xlu0 %v3181_v40, 272  ;;  %v3065_v42 = vmul.f32 %v6345_v4, %v2967_v8  ;;  %v6545_v4 = vpop.xlane.xlu0 %1768 }
 0x62d   : > { %v3064_v10 = vmul.f32 %v6333_v22, %v2966_v1  ;;  %v2906_v16 = vadd.f32 %v2905_v43, %v6337_v33  ;;  %3316 = vbcast.lane.b32.xlu1 %v3181_v40, 280  ;;  %v6547_v22 = vpop.xlane.xlu1 %1774 }
 0x62e   : > { %v3197_v47 = vrot.slane %v3196_v44, 2  ;;  %v3205_v14 = vadd.f32 %v3204_v27, %v3203_v37  ;;  %v2969_v50 = vmax.f32 %v2911_v20, 0.0  ;;  %v3208_v55 = vsel %vm600_vm0, %v3065_v42, 0.0 }
 0x62f   : > { %v3206_v53 = vsel %vm600_vm0, %v3064_v10, 0.0  ;;  %v2968_v54 = vmax.f32 %v2906_v16, 0.0 }
 0x630   : > { %v3207_v5 = vadd.f32 %v3206_v53, %v3205_v14  ;;  %v3198_v57 = vadd.f32 %v3197_v47, %v3196_v44  ;;  %v3067_v49 = vmul.f32 %v6356_v26, %v2969_v50  ;;  %v6551_v59 = vpop.xlane.xlu0 %1783 }
 0x631   : > { %v3066_v51 = vmul.f32 %v6349_v56, %v2968_v54  ;;  %v6553_v26 = vpop.xlane.xlu1 %1777 }
 0x632   : > { %v3209_v33 = vadd.f32 %v3208_v55, %v3207_v5  ;;  %v3199_v29 = vrot.slane %v3198_v57, 1  ;;  %v3212_v40 = vsel %vm600_vm0, %v3067_v49, 0.0 }
 0x633   : > { %v3210_v38 = vsel %vm600_vm0, %v3066_v51, 0.0 }
 0x634   : > { %v3211_v25 = vadd.f32 %v3210_v38, %v3209_v33  ;;  %v3200_v34 = vadd.f32 %v3199_v29, %v3198_v57  ;;  %v6555_v60 = vpop.xlane.xlu0 %1780  ;;  %v3412_v38 = vld [vmem:[#allocation17] sm:$0xff] }
 0x635   : > { %v6557_v3 = vpop.xlane.xlu1 %1786 }
 0x636   : > { %v3213_v6 = vadd.f32 %v3212_v40, %v3211_v25  ;;  %3323 = vbcast.lane.b32.xlu0 %v3200_v34, 264  ;;  %3319 = vbcast.lane.b32.xlu1 %v3200_v34, 256 }
 0x638   : > { %v3214_v56 = vrot.slane %v3213_v6, 4  ;;  %v6559_v31 = vpop.xlane.xlu0 %1795 }
 0x639   : > { %v6561_v0 = vpop.xlane.xlu1 %1789 }
 0x63a   : > { %v3215_v45 = vadd.f32 %v3214_v56, %v3213_v6  ;;  %3327 = vbcast.lane.b32.xlu0 %v3200_v34, 272  ;;  %3331 = vbcast.lane.b32.xlu1 %v3200_v34, 280  ;;  %v5299_v34 = vmov 0.0|0.0  }
 0x63b   : > { %4719 = vmatprep.subr.bf16.mxu1 %v5299_v34 }
 0x63c   : > { %v3216_v21 = vrot.slane %v3215_v45, 2  ;;  %v6563_v8 = vpop.xlane.xlu0 %1792 }
 0x63d   : > { %v6565_v12 = vpop.xlane.xlu1 %1798 }
 0x63e   : > { %v3217_v30 = vadd.f32 %v3216_v21, %v3215_v45 }
 0x640   : > { %v3218_v62 = vrot.slane %v3217_v30, 1  ;;  %v6567_v11 = vpop.xlane.xlu0 %1804 }
 0x641   : > { %v6569_v1 = vpop.xlane.xlu1 %1801 }
 0x642   : > { %v3219_v2 = vadd.f32 %v3218_v62, %v3217_v30 }
 0x644   : > { %3338 = vbcast.lane.b32.xlu0 %v3219_v2, 264  ;;  %3334 = vbcast.lane.b32.xlu1 %v3219_v2, 256 }
 0x648   : > { %3342 = vbcast.lane.b32.xlu0 %v3219_v2, 272  ;;  %3346 = vbcast.lane.b32.xlu1 %v3219_v2, 280 }
 0x654   : > { %v3234_v61 = vpop.permute.xlu0 %3233  ;;  %v3230_v44 = vpop.permute.xlu1 %3229 }
 0x655   : > { %v3381_v37 = vadd.f32 %v3234_v61, %v6430_v24  ;;  %v3380_v20 = vadd.f32 %v3230_v44, %v6404_v35 }
 0x657   : > { %3459 = vperm.xlu1 %4886, %v3381_v37   ;;  %3456 = vperm.xlu0 %4885, %v3380_v20  }
 0x658   : > { %v3238_v43 = vpop.permute.xlu0 %3237 }
 0x659   : > { %v3382_v27 = vadd.f32 %v3238_v43, %v6445_v19 }
 0x65b   : > { %3462 = vperm.xlu0 %4885, %v3382_v27  }
 0x65c   : > { %v3242_v42 = vpop.permute.xlu0 %3241 }
 0x65d   : > { %v3383_v10 = vadd.f32 %v3242_v42, %v6470_v15 }
 0x65f   : > { %3465 = vperm.xlu0 %4885, %v3383_v10  }
 0x662   : > { %v3245_v16 = vpop.permute.xlu1 %3244 }
 0x663   : > { %v3384_v47 = vadd.f32 %v3245_v16, %v6415_v52 }
 0x665   : > { %3468 = vperm.xlu0 %4885, %v3384_v47  }
 0x666   : > { %v3249_v14 = vpop.permute.xlu1 %3248 }
 0x667   : > { %v3385_v50 = vadd.f32 %v3249_v14, %v6427_v63 }
 0x669   : > { %3471 = vperm.xlu1 %4886, %v3385_v50  }
 0x66a   : > { %v3253_v24 = vpop.permute.xlu1 %3252 }
 0x66b   : > { %v3386_v35 = vadd.f32 %v3253_v24, %v6440_v23 }
 0x66d   : > { %3474 = vperm.xlu1 %4886, %v3386_v35  }
 0x66e   : > { %v3257_v53 = vpop.permute.xlu1 %3256 }
 0x66f   : > { %v3387_v19 = vadd.f32 %v3257_v53, %v6465_v46 }
 0x670   : > { %v3260_v54 = vpop.permute.xlu0 %3259 }
 0x671   : > { %v3388_v5 = vadd.f32 %v3260_v54, %v6456_v36  ;;  %3477 = vperm.xlu1 %4886, %v3387_v19  }
 0x672   : > { %v3264_v15 = vpop.permute.xlu1 %3263 }
 0x673   : > { %v3389_v57 = vadd.f32 %v3264_v15, %v6453_v58  ;;  %3480 = vperm.xlu0 %4885, %v3388_v5  }
 0x674   : > { %v3268_v52 = vpop.permute.xlu0 %3267 }
 0x675   : > { %v3390_v55 = vadd.f32 %v3268_v52, %v6482_v41  ;;  %3483 = vperm.xlu1 %4886, %v3389_v57   ;;  %v3413_v41 = vld [vmem:[#allocation17 + $0x8] sm:$0xff] }
 0x676   : > { %v3272_v63 = vpop.permute.xlu1 %3271 }
 0x677   : > { %v3391_v49 = vadd.f32 %v3272_v63, %v6492_v9  ;;  %3486 = vperm.xlu0 %4885, %v3390_v55   ;;  %v4720_v9 = vpack.c.bf16 %v3413_v41, %v3412_v38 }
 0x679   : > { %3489 = vperm.xlu1 %4886, %v3391_v49   ;;  %4721 = vmatpush3.bf16.msra.mxu1 %v4720_v9 }
 0x67a   : > { %4722 = vmatprep.subr.bf16.mxu1 %v5299_v34 }
 0x67e   : > { %v3279_v23 = vpop.permute.xlu0 %3278  ;;  %v3275_v51 = vpop.permute.xlu1 %3274 }
 0x67f   : > { %v3393_v46 = vadd.f32 %v3279_v23, %v6497_v28  ;;  %v3392_v36 = vadd.f32 %v3275_v51, %v6479_v13 }
 0x681   : > { %3495 = vperm.xlu0 %4885, %v3393_v46   ;;  %3492 = vperm.xlu1 %4886, %v3392_v36   ;;  %v3551_v46 = vlaneseq }
 0x682   : > { %v3283_v33 = vpop.permute.xlu0 %3282 }
 0x683   : > { %v3394_v58 = vadd.f32 %v3283_v33, %v6508_v17  ;;  %v3287_v29 = vpop.permute.xlu1 %3286  ;;  %v3552_v36 = vand.u32 127, %v3551_v46 }
 0x684   : > { %v3395_v25 = vadd.f32 %v3287_v29, %v6517_v48  ;;  %v3554_v29 = vshrl.u32 %v3551_v46, 7 }
 0x685   : > { %3498 = vperm.xlu0 %4885, %v3394_v58   ;;  %v3557_v38 = vadd.s32 4294967288, %v3552_v36  ;;  %v3571_v9 = vadd.s32 4294967272, %v3552_v36 }
 0x686   : > { %3501 = vperm.xlu1 %4886, %v3395_v25   ;;  %v3564_v25 = vadd.s32 4294967280, %v3552_v36 }
 0x68c   : > { %v3294_v28 = vpop.permute.xlu0 %3293  ;;  %v3290_v40 = vpop.permute.xlu1 %3289 }
 0x68d   : > { %v3397_v13 = vadd.f32 %v3294_v28, %v6522_v39  ;;  %v3396_v6 = vadd.f32 %v3290_v40, %v6505_v18  ;;  %v6625_v28 = vsub.s32 %v3552_v36, %v3554_v29  ;;  %v6627_v40 = vsub.s32 %v3557_v38, %v3554_v29 }
 0x68f   : > { %3507 = vperm.xlu0 %4885, %v3397_v13   ;;  %3504 = vperm.xlu1 %4886, %v3396_v6   ;;  %v6629_v13 = vsub.s32 %v3564_v25, %v3554_v29  ;;  %v6631_v6 = vsub.s32 %v3571_v9, %v3554_v29 }
 0x690   : > { %v3298_v17 = vpop.permute.xlu0 %3297  ;;  %v3302_v56 = vpop.permute.xlu1 %3301 }
 0x691   : > { %v3398_v45 = vadd.f32 %v3298_v17, %v6534_v32  ;;  %v3399_v48 = vadd.f32 %v3302_v56, %v6545_v4  ;;  %v3414_v32 = vld [vmem:[#allocation17 + $0x10] sm:$0xff]  ;;  %v3415_v4 = vld [vmem:[#allocation17 + $0x18] sm:$0xff] }
 0x692   : > { %v4723_v37 = vpack.c.bf16 %v3415_v4, %v3414_v32 }
 0x693   : > { %3510 = vperm.xlu0 %4885, %v3398_v45   ;;  %3513 = vperm.xlu1 %4886, %v3399_v48  }
 0x694   : > { %4724 = vmatpush3.bf16.msra.mxu1 %v4723_v37 }
 0x69a   : > { %v3309_v21 = vpop.permute.xlu0 %3308  ;;  %v3305_v30 = vpop.permute.xlu1 %3304 }
 0x69b   : > { %v3401_v62 = vadd.f32 %v3309_v21, %v6547_v22  ;;  %v3400_v2 = vadd.f32 %v3305_v30, %v6530_v7 }
 0x69d   : > { %3519 = vperm.xlu0 %4885, %v3401_v62   ;;  %3516 = vperm.xlu1 %4886, %v3400_v2  }
 0x69e   : > { %v3313_v39 = vpop.permute.xlu0 %3312 }
 0x69f   : > { %v3402_v18 = vadd.f32 %v3313_v39, %v6553_v26  ;;  %v3317_v61 = vpop.permute.xlu1 %3316 }
 0x6a0   : > { %v3403_v44 = vadd.f32 %v3317_v61, %v6555_v60 }
 0x6a1   : > { %3522 = vperm.xlu0 %4885, %v3402_v18  }
 0x6a2   : > { %3525 = vperm.xlu1 %4886, %v3403_v44  }
 0x6a8   : > { %v3324_v20 = vpop.permute.xlu0 %3323  ;;  %v3320_v43 = vpop.permute.xlu1 %3319 }
 0x6a9   : > { %v3405_v22 = vadd.f32 %v3324_v20, %v6557_v3  ;;  %v3404_v7 = vadd.f32 %v3320_v43, %v6551_v59 }
 0x6ab   : > { %3531 = vperm.xlu0 %4885, %v3405_v22   ;;  %3528 = vperm.xlu1 %4886, %v3404_v7  }
 0x6ac   : > { %v3328_v27 = vpop.permute.xlu0 %3327  ;;  %v3332_v42 = vpop.permute.xlu1 %3331 }
 0x6ad   : > { %v3406_v26 = vadd.f32 %v3328_v27, %v6561_v0  ;;  %v3407_v60 = vadd.f32 %v3332_v42, %v6563_v8  ;;  %v5301_v0 = vmov 0.0  }
 0x6ae   : > { %4676 = vmatprep.mubr.msk.f32.mxu1 %vm5300_vm3, %v5301_v0 }
 0x6af   : > { %3534 = vperm.xlu0 %4885, %v3406_v26   ;;  %3537 = vperm.xlu1 %4886, %v3407_v60  }
 0x6b6   : > { %v3339_v10 = vpop.permute.xlu0 %3338  ;;  %v3335_v16 = vpop.permute.xlu1 %3334 }
 0x6b7   : > { %v3409_v47 = vadd.f32 %v3339_v10, %v6565_v12  ;;  %v3408_v14 = vadd.f32 %v3335_v16, %v6559_v31 }
 0x6b9   : > { %3543 = vperm.xlu0 %4885, %v3409_v47   ;;  %3540 = vperm.xlu1 %4886, %v3408_v14  }
 0x6ba   : > { %v3343_v3 = vpop.permute.xlu0 %3342  ;;  %v3347_v59 = vpop.permute.xlu1 %3346 }
 0x6bb   : > { %v3410_v50 = vadd.f32 %v3343_v3, %v6569_v1  ;;  %v3411_v24 = vadd.f32 %v3347_v59, %v6567_v11 }
 0x6bd   : > { %3546 = vperm.xlu0 %4885, %v3410_v50   ;;  %3549 = vperm.xlu1 %4886, %v3411_v24  }
 0x6d6   : > { %v3460_v8 = vpop.permute.xlu1 %3459  ;;  %v3457_v35 = vpop.permute.xlu0 %3456 }
 0x6d7   : > { %v3556_v45 = vrot.slane %v3457_v35, %v6625_v28  ;;  %v3561_v48 = vrot.slane %v3460_v8, %v6627_v40 }
 0x6d9   : > { %v3563_v18 = vsel %vm3562_vm4, %v3561_v48, %v3556_v45 }
 0x6da   : > { %v3463_v19 = vpop.permute.xlu0 %3462 }
 0x6db   : > { %v3568_v21 = vrot.slane %v3463_v19, %v6629_v13 }
 0x6dd   : > { %v3570_v32 = vsel %vm3569_vm5, %v3568_v21, %v3563_v18 }
 0x6de   : > { %v3466_v31 = vpop.permute.xlu0 %3465 }
 0x6df   : > { %v3575_v30 = vrot.slane %v3466_v31, %v6631_v6 }
 0x6e1   : > { %v3577_v4 = vsel %vm3576_vm6, %v3575_v30, %v3570_v32 }
 0x6e4   : > { %v3469_v5 = vpop.permute.xlu0 %3468 }
 0x6e5   : > { %v3581_v61 = vrot.slane %v3469_v5, %v6625_v28 }
 0x6e8   : > { %v3472_v53 = vpop.permute.xlu1 %3471 }
 0x6e9   : > { %v3585_v62 = vrot.slane %v3472_v53, %v6627_v40 }
 0x6eb   : > { %v3586_v37 = vsel %vm3562_vm4, %v3585_v62, %v3581_v61 }
 0x6ec   : > { %v6603_v12 = vpop.permute.xlu1 %3474 }
 0x6ed   : > { %v3590_v43 = vrot.slane %v6603_v12, %v6629_v13 }
 0x6f0   : > { %v6605_v54 = vpop.permute.xlu1 %3477 }
 0x6f1   : > { %v3595_v47 = vrot.slane %v6605_v54, %v6631_v6  ;;  %v3591_v54 = vsel %vm3569_vm5, %v3590_v43, %v3586_v37 }
 0x6f2   : > { %v3481_v15 = vpop.permute.xlu0 %3480 }
 0x6f3   : > { %v3600_v20 = vrot.slane %v3481_v15, %v6625_v28 }
 0x6f4   : > { %v3484_v57 = vpop.permute.xlu1 %3483 }
 0x6f5   : > { %v3604_v44 = vrot.slane %v3484_v57, %v6627_v40 }
 0x6f6   : > { %v6607_v1 = vpop.permute.xlu0 %3486 }
 0x6f7   : > { %v3609_v22 = vrot.slane %v6607_v1, %v6629_v13  ;;  %v3605_v42 = vsel %vm3562_vm4, %v3604_v44, %v3600_v20  ;;  %v3596_v1 = vsel %vm3576_vm6, %v3595_v47, %v3591_v54  ;;  %v4174_v44 = vld [vmem:[#allocation19] ss:$0 sm:$0xff] }
 0x6f8   : > { %v6609_v11 = vpop.permute.xlu1 %3489 }
 0x6f9   : > { %v3614_v24 = vrot.slane %v6609_v11, %v6631_v6  ;;  %v3610_v53 = vsel %vm3569_vm5, %v3609_v22, %v3605_v42 }
 0x700   : > { %v6611_v52 = vpop.permute.xlu0 %3495  ;;  %v3493_v55 = vpop.permute.xlu1 %3492 }
 0x701   : > { %v3623_v7 = vrot.slane %v6611_v52, %v6627_v40  ;;  %v3619_v27 = vrot.slane %v3493_v55, %v6625_v28 }
 0x703   : > { %v3624_v19 = vsel %vm3562_vm4, %v3623_v7, %v3619_v27 }
 0x704   : > { %v6613_v63 = vpop.permute.xlu0 %3498 }
 0x705   : > { %v6615_v49 = vpop.permute.xlu1 %3501  ;;  %v3628_v26 = vrot.slane %v6613_v63, %v6629_v13 }
 0x706   : > { %v3633_v12 = vrot.slane %v6615_v49, %v6631_v6 }
 0x707   : > { %v3629_v5 = vsel %vm3569_vm5, %v3628_v26, %v3624_v19 }
 0x70e   : > { %v6617_v23 = vpop.permute.xlu0 %3507  ;;  %v6619_v51 = vpop.permute.xlu1 %3504 }
 0x70f   : > { %v3642_v60 = vrot.slane %v6617_v23, %v6627_v40  ;;  %v3638_v10 = vrot.slane %v6619_v51, %v6625_v28  ;;  %v3615_v23 = vsel %vm3576_vm6, %v3614_v24, %v3610_v53 }
 0x711   : > { %v3643_v15 = vsel %vm3562_vm4, %v3642_v60, %v3638_v10 }
 0x712   : > { %v6621_v33 = vpop.permute.xlu0 %3510  ;;  %v6623_v58 = vpop.permute.xlu1 %3513 }
 0x713   : > { %v3647_v14 = vrot.slane %v6621_v33, %v6629_v13  ;;  %v3652_v57 = vrot.slane %v6623_v58, %v6631_v6  ;;  %v3634_v33 = vsel %vm3576_vm6, %v3633_v12, %v3629_v5 }
 0x715   : > { %v3648_v11 = vsel %vm3569_vm5, %v3647_v14, %v3643_v15 }
 0x716   : > { %v3653_v25 = vsel %vm3576_vm6, %v3652_v57, %v3648_v11 }
 0x71c   : > { %v3520_v41 = vpop.permute.xlu0 %3519  ;;  %v3517_v34 = vpop.permute.xlu1 %3516 }
 0x71d   : > { %v3661_v3 = vrot.slane %v3520_v41, %v6627_v40  ;;  %v3657_v59 = vrot.slane %v3517_v34, %v6625_v28  ;;  %v3712_v41 = vsel %vm3711_vm7, %v3596_v1, %v3577_v4 }
 0x71e   : > { %v3714_v34 = vsel %vm3713_vm8, %v3615_v23, %v3712_v41 }
 0x71f   : > { %v3662_v52 = vsel %vm3562_vm4, %v3661_v3, %v3657_v59  ;;  %v3716_v45 = vsel %vm3715_vm9, %v3634_v33, %v3714_v34 }
 0x720   : > { %v3523_v17 = vpop.permute.xlu0 %3522  ;;  %v3718_v21 = vsel %vm3717_vm10, %v3653_v25, %v3716_v45 }
 0x721   : > { %v6633_v56 = vpop.permute.xlu1 %3525  ;;  %v3666_v0 = vrot.slane %v3523_v17, %v6629_v13 }
 0x722   : > { %v3671_v55 = vrot.slane %v6633_v56, %v6631_v6 }
 0x723   : > { %v3667_v51 = vsel %vm3569_vm5, %v3666_v0, %v3662_v52 }
 0x724   : > { %v3672_v9 = vsel %vm3576_vm6, %v3671_v55, %v3667_v51 }
 0x725   : > { %v3720_v62 = vsel %vm3719_vm11, %v3672_v9, %v3718_v21 }
 0x72a   : > { %v3532_v2 = vpop.permute.xlu0 %3531  ;;  %v3529_v39 = vpop.permute.xlu1 %3528 }
 0x72b   : > { %v3680_v8 = vrot.slane %v3532_v2, %v6627_v40  ;;  %v3676_v35 = vrot.slane %v3529_v39, %v6625_v28 }
 0x72d   : > { %v3681_v46 = vsel %vm3562_vm4, %v3680_v8, %v3676_v35 }
 0x72e   : > { %v3535_v16 = vpop.permute.xlu0 %3534  ;;  %v3538_v50 = vpop.permute.xlu1 %3537 }
 0x72f   : > { %v3685_v31 = vrot.slane %v3535_v16, %v6629_v13  ;;  %v3690_v36 = vrot.slane %v3538_v50, %v6631_v6 }
 0x731   : > { %v3686_v58 = vsel %vm3569_vm5, %v3685_v31, %v3681_v46 }
 0x738   : > { %v3544_v63 = vpop.permute.xlu0 %3543  ;;  %v3541_v49 = vpop.permute.xlu1 %3540 }
 0x739   : > { %v3699_v29 = vrot.slane %v3544_v63, %v6627_v40  ;;  %v3695_v38 = vrot.slane %v3541_v49, %v6625_v28  ;;  %v3691_v40 = vsel %vm3576_vm6, %v3690_v36, %v3686_v58 }
 0x73a   : > { %v3722_v39 = vsel %vm3721_vm12, %v3691_v40, %v3720_v62 }
 0x73b   : > { %v3700_v30 = vsel %vm3562_vm4, %v3699_v29, %v3695_v38 }
 0x73c   : > { %v3547_v17 = vpop.permute.xlu0 %3546  ;;  %v3550_v56 = vpop.permute.xlu1 %3549 }
 0x73d   : > { %v3704_v28 = vrot.slane %v3547_v17, %v6629_v13  ;;  %v3709_v48 = vrot.slane %v3550_v56, %v6631_v6 }
 0x73f   : > { %v3705_v2 = vsel %vm3569_vm5, %v3704_v28, %v3700_v30 }
 0x740   : > { %v3710_v18 = vsel %vm3576_vm6, %v3709_v48, %v3705_v2 }
 0x741   : > { %v3724_v61 = vsel %vm3723_vm13, %v3710_v18, %v3722_v39 }
 0x742   : > { %4677 = vmatmul.mubr.msk.f32.vlgmr.msra.gmra.mrb[82].mxu1 %vm600_vm0, %v3724_v61 }
 0x815   : > { %v3793_v13 = vpop.f32.mrb[82].mxu1 }
 0x816   : > { %v3794_v6 = vadd.f32 %v4174_v44, %v3793_v13  ;;  %v4678_v32 = vpop.f32.mrb[83].mxu1 }
 0x818   : > { %3797 = vst [vmem:[%s546_s21] sm:$0xff] %v3794_v6 }
 0x819   : > { %5210 = shalt.err (!%p5207_p0)
}
 0x81a   : > { %s5211_s13 = scalar_lea.hbm %s6712_s3, 128  ;;  %s5215_s28 = scalar_lea.hbm %s6834_s2, 256 }
 0x81b   : > { %p5212_p6 = scmp.ne.s32.totalorder %s6712_s3, %s5211_s13  ;;  %p5216_p9 = scmp.lt.u32.totalorder %s6712_s3, %s6834_s2 }
 0x81c   : > { %p5217_p12 = scmp.lt.u32.totalorder %s5215_s28, %s5211_s13  ;;  %p5219_p1 = scmp.lt.u32.totalorder %s5211_s13, %s6712_s3 }
 0x81d   : > { %p5213_p7 = pnand %p5212_p6, %p6835_p3 }
 0x81e   : > { %p5218_p13 = por %p5217_p12, %p5216_p9 }
 0x81f   : > { %p5214_p5 = pneg %p5213_p7 }
 0x820   : > { %p5220_p2 = por %p5219_p1, %p5218_p13 }
 0x822   : > { %p5221_p8 = pnand %p5220_p2, %p5214_p5 }
 0x824   : > { %5224 = shalt.err (!%p5221_p8)
}
 0x825   : > { %4774 = dma.vmem_to_hbm [thread:$0]  (%p6835_p3), %s6714_s16, 128, %s6712_s3, %s3799_s12  }
 0x826 PF: > { %s3824_s14 = sand.u32 1, %s5271_s17   ;;  %p6836_p4 = scmp.ne.s32.totalorder %s6804_s22, 0 }
 0x827   : > { %p6837_p10 = scmp.ge.s32.totalorder %s5283_s20, 2  ;;  %s3825_s24 = scalar_lea.sflag [#allocation4], %s3824_s14 }
 0x829   : > { %p4812_p11 = pnand %p6837_p10, %p6836_p4 }
 0x82b   : > { %5266 = dma.done.wait (!%p4812_p11), %s3825_s24, 128  }
 0x82c   : > { %5268 = vsyncadd (!%p4812_p11), %s3825_s24, 4294967168  ;;  %p29_p0 = scmp.ge.s32.totalorder %s5635_s27, 4   ;;  %s6838_s17 = smov %s5275_s18 }
 0x82d   : > { %s6839_s18 = smov %s5279_s19  ;;  %s6840_s19 = smov %s5646_s25 }
 0x82e   : > { %s6841_s20 = smov %s5635_s27  ;;  %31 = sbr.rel (!%p29_p0) target bundleno = 16 (0x10), region = 149 }
 0x835   :  { %3830 = vsyncpa [#allocation3], 1 }
 0x836   :  { %3832 = vsyncpa [#allocation3 + $0x1], 1 }
 0x837   :  { %3833 = vsyncpa [#allocation6], 1 }
 0x838   :  { %3834 = vsyncpa [#allocation9], 1 }
 0x839   :  { %3835 = vsyncpa [#allocation12], 1 }
 0x83a   :  { %3836 = vsyncpa [#allocation15], 1 }
 0x83b   :  { %3837 = vsyncpa [#allocation18], 1 }
 0x83c   :  { %3838 = vsyncpa [#allocation4], 1 }
 0x83d   :  { %3840 = vsyncpa [#allocation4 + $0x1], 1 }

</bundles_post_ra>
